<compile_context>
chip_gen: v7x
topology: tpu7x:2x2x1
jax: 0.10.0
libtpu: 0.0.40
codegen_flags: <defaults>
</compile_context>

<pallas_src>
import functools

import jax
import jax.numpy as jnp
from jax import lax
from jax.experimental import pallas as pl
from jax.experimental.pallas import tpu as pltpu

_NEG_BIG = -1e30  # finite "-inf" for lane-padded logit columns (exp -> 0 exactly)


def _streaming_sight_kernel(
    # inputs
    xs_ref, h0_ref, h1_ref, h2_ref,
    w1x_ref, w1h_ref, b1_ref,
    w2x_ref, w2h_ref, b2_ref,
    w3x_ref, w3h_ref, b3_ref,
    wo_ref, bo_ref,
    # outputs
    logp_ref, h0o_ref, h1o_ref, h2o_ref,
    *, t_total, t_chunk,
):
    c = pl.program_id(0)
    b_pad = xs_ref.shape[1]
    hid = h0o_ref.shape[-1]
    out_pad = wo_ref.shape[-1]

    # ---- hoisted loop-invariant loads & bias broadcasts (once per chunk) ----
    w1x = w1x_ref[...]
    w1h = w1h_ref[...]
    w2x = w2x_ref[...]
    w2h = w2h_ref[...]
    w3x = w3x_ref[...]
    w3h = w3h_ref[...]
    wo = wo_ref[...]
    b1 = jnp.broadcast_to(b1_ref[...], (b_pad, hid))
    b2 = jnp.broadcast_to(b2_ref[...], (b_pad, hid))
    b3 = jnp.broadcast_to(b3_ref[...], (b_pad, hid))
    bo = jnp.broadcast_to(bo_ref[...], (b_pad, out_pad))

    # ---- initialize the cross-chunk recurrent state on the first chunk ----
    @pl.when(c == 0)
    def _():
        h0o_ref[...] = h0_ref[...]
        h1o_ref[...] = h1_ref[...]
        h2o_ref[...] = h2_ref[...]

    # State is read from VMEM once per chunk and carried in vregs in the loop.
    h0 = h0o_ref[...]
    h1 = h1o_ref[...]
    h2 = h2o_ref[...]

    padded_tail = (t_total % t_chunk) != 0  # static Python bool (trace time)

    def step(t, carry):
        h0, h1, h2 = carry
        x = xs_ref[t]                                         # (b_pad, in_dim)

        # layer 1: relu(Linear(cat[x, h0])) == relu(x@W1x + h0@W1h + b1)
        nh0 = jnp.maximum(
            jnp.dot(x, w1x, preferred_element_type=jnp.float32)
            + jnp.dot(h0, w1h, preferred_element_type=jnp.float32) + b1, 0.0)
        # dropout1: identity (eval mode)

        # layer 2
        nh1 = jnp.maximum(
            jnp.dot(nh0, w2x, preferred_element_type=jnp.float32)
            + jnp.dot(h1, w2h, preferred_element_type=jnp.float32) + b2, 0.0)
        # dropout2: identity (eval mode)

        # layer 3
        nh2 = jnp.maximum(
            jnp.dot(nh1, w3x, preferred_element_type=jnp.float32)
            + jnp.dot(h2, w3h, preferred_element_type=jnp.float32) + b3, 0.0)
        # dropout3: identity (eval mode)

        # flatten is a no-op on (B, H); relu(nh2) is redundant since nh2 >= 0.
        logits = jnp.dot(nh2, wo, preferred_element_type=jnp.float32) + bo
        # log_softmax over the 128 padded lanes; padded columns carry -1e30
        # bias so they contribute exactly 0 to the sum and never win the max.
        m = jnp.max(logits, axis=-1, keepdims=True)
        lse = jnp.log(jnp.sum(jnp.exp(logits - m), axis=-1, keepdims=True)) + m
        logp_ref[t] = logits - lse                            # lane-dense store

        if padded_tail:
            valid = (c * t_chunk + t) < t_total
            nh0 = jnp.where(valid, nh0, h0)
            nh1 = jnp.where(valid, nh1, h1)
            nh2 = jnp.where(valid, nh2, h2)
        return (nh0, nh1, nh2)

    h0, h1, h2 = lax.fori_loop(0, t_chunk, step, (h0, h1, h2),
                               unroll=min(t_chunk, 8))

    # Write the recurrent state back once per chunk (not once per step).
    h0o_ref[...] = h0
    h1o_ref[...] = h1
    h2o_ref[...] = h2


def streaming_sight_forward_steps(xs, h, params, *, t_chunk=8):
    """Run T streaming steps in one kernel call.

    xs: (T, B, input_dim) float32
    h : list of 3 arrays (B, hidden) float32 (initial recurrent state)
    returns (log_probs (T, B, out_dim), [h0, h1, h2] final state)
    """
    T, B, input_dim = xs.shape
    assert T >= 1
    W1x, W1h, b1, W2x, W2h, b2, W3x, W3h, b3, Wo, bo = params
    hidden = W1h.shape[0]
    out_dim = Wo.shape[1]

    f32 = jnp.float32
    B_pad = max(8, ((B + 7) // 8) * 8)          # sublane-pad the batch
    OUT_PAD = max(128, ((out_dim + 127) // 128) * 128)  # lane-pad the head
    T_CHUNK = min(T, t_chunk)
    n_chunks = (T + T_CHUNK - 1) // T_CHUNK
    T_pad = n_chunks * T_CHUNK

    xs_p = jnp.zeros((T_pad, B_pad, input_dim), f32).at[:T, :B].set(xs.astype(f32))
    h_p = [jnp.zeros((B_pad, hidden), f32).at[:B].set(hi.astype(f32)) for hi in h]
    Wo_p = jnp.zeros((hidden, OUT_PAD), f32).at[:, :out_dim].set(Wo)
    bo_p = jnp.full((1, OUT_PAD), _NEG_BIG, f32).at[:, :out_dim].set(bo)

    def full(shape):
        return pl.BlockSpec(shape, lambda c: (0,) * len(shape))

    kernel = functools.partial(_streaming_sight_kernel,
                               t_total=T, t_chunk=T_CHUNK)

    out_shapes = (
        jax.ShapeDtypeStruct((T_pad, B_pad, OUT_PAD), f32),  # per-step log-probs
        jax.ShapeDtypeStruct((B_pad, hidden), f32),          # final nh0
        jax.ShapeDtypeStruct((B_pad, hidden), f32),          # final nh1
        jax.ShapeDtypeStruct((B_pad, hidden), f32),          # final nh2
    )

    logp, h0n, h1n, h2n = pl.pallas_call(
        kernel,
        grid=(n_chunks,),
        in_specs=[
            pl.BlockSpec((T_CHUNK, B_pad, input_dim), lambda c: (c, 0, 0)),
            full((B_pad, hidden)), full((B_pad, hidden)), full((B_pad, hidden)),
            full((input_dim, hidden)), full((hidden, hidden)), full((1, hidden)),
            full((hidden, hidden)), full((hidden, hidden)), full((1, hidden)),
            full((hidden, hidden)), full((hidden, hidden)), full((1, hidden)),
            full((hidden, OUT_PAD)), full((1, OUT_PAD)),
        ],
        out_specs=(
            pl.BlockSpec((T_CHUNK, B_pad, OUT_PAD), lambda c: (c, 0, 0)),
            full((B_pad, hidden)), full((B_pad, hidden)), full((B_pad, hidden)),
        ),
        out_shape=out_shapes,
        compiler_params=pltpu.CompilerParams(
            dimension_semantics=("arbitrary",)),  # T chunks are a serial recurrence
    )(xs_p, h_p[0], h_p[1], h_p[2],
      W1x, W1h, b1, W2x, W2h, b2, W3x, W3h, b3, Wo_p, bo_p)

    return logp[:T, :B, :out_dim], [h0n[:B], h1n[:B], h2n[:B]]


def streaming_sight_forward(x, h, params):
    """Original single-step module signature: x (B, 1, input_dim), h = 3x(B, hidden)."""
    B, S, input_dim = x.shape
    assert S == 1, "squeeze(1) in the reference requires seq_length == 1"
    xs = jnp.transpose(x, (1, 0, 2))  # (1, B, input_dim)
    logp, hnew = streaming_sight_forward_steps(xs, h, params)
    return logp[0], hnew


def init_params(key, input_dim, hidden, out_dim):
    """Per-layer weights stored transposed and split into x-part / h-part:
       W1x:(in,hid) W1h:(hid,hid) W2x/W2h/W3x/W3h:(hid,hid) Wo:(hid,out)."""
    ks = jax.random.split(key, 11)
    s = 0.1
    n = jax.random.normal
    W1x = s * n(ks[0], (input_dim, hidden), jnp.float32)
    W1h = s * n(ks[1], (hidden, hidden), jnp.float32)
    b1 = s * n(ks[2], (1, hidden), jnp.float32)
    W2x = s * n(ks[3], (hidden, hidden), jnp.float32)
    W2h = s * n(ks[4], (hidden, hidden), jnp.float32)
    b2 = s * n(ks[5], (1, hidden), jnp.float32)
    W3x = s * n(ks[6], (hidden, hidden), jnp.float32)
    W3h = s * n(ks[7], (hidden, hidden), jnp.float32)
    b3 = s * n(ks[8], (1, hidden), jnp.float32)
    Wo = s * n(ks[9], (hidden, out_dim), jnp.float32)
    bo = s * n(ks[10], (1, out_dim), jnp.float32)
    return (W1x, W1h, b1, W2x, W2h, b2, W3x, W3h, b3, Wo, bo)


def _ref_step(x2, h, params):
    """Pure-JAX single-step reference (matches the PyTorch forward)."""
    W1x, W1h, b1, W2x, W2h, b2, W3x, W3h, b3, Wo, bo = params
    nh0 = jax.nn.relu(x2 @ W1x + h[0] @ W1h + b1)
    nh1 = jax.nn.relu(nh0 @ W2x + h[1] @ W2h + b2)
    nh2 = jax.nn.relu(nh1 @ W3x + h[2] @ W3h + b3)
    logits = jax.nn.relu(nh2) @ Wo + bo
    return jax.nn.log_softmax(logits, axis=-1), [nh0, nh1, nh2]


def _ref_stream(xs, h, params):
    logps = []
    for t in range(xs.shape[0]):
        lp, h = _ref_step(xs[t], h, params)
        logps.append(lp)
    return jnp.stack(logps, axis=0), h


if __name__ == "__main__":
    key = jax.random.PRNGKey(0)
    T, B, input_dim, hidden, out_dim = 8, 2, 32, 32, 8

    kx, k0, k1, k2, kp = jax.random.split(key, 5)
    xs = jax.random.normal(kx, (T, B, input_dim), jnp.float32)
    h = [
        jax.random.normal(k0, (B, hidden), jnp.float32),
        jax.random.normal(k1, (B, hidden), jnp.float32),
        jax.random.normal(k2, (B, hidden), jnp.float32),
    ]
    params = init_params(kp, input_dim, hidden, out_dim)

    # --- multi-step (amortized) kernel call ---
    logp_all, h_final = streaming_sight_forward_steps(xs, h, params)
    jax.block_until_ready(logp_all)
    for hh in h_final:
        jax.block_until_ready(hh)

    ref_logps, href = _ref_stream(xs, h, params)
    assert jnp.allclose(logp_all, ref_logps, atol=1e-4, rtol=1e-4)
    for a, b in zip(h_final, href):
        assert jnp.allclose(a, b, atol=1e-4, rtol=1e-4)

    # --- non-divisible T exercises the masked padded-tail path ---
    T2 = 5
    logp5, h5 = streaming_sight_forward_steps(xs[:T2], h, params, t_chunk=4)
    jax.block_until_ready(logp5)
    ref_logp5, ref_h5 = _ref_stream(xs[:T2], h, params)
    assert jnp.allclose(logp5, ref_logp5, atol=1e-4, rtol=1e-4)
    for a, b in zip(h5, ref_h5):
        assert jnp.allclose(a, b, atol=1e-4, rtol=1e-4)

    # --- single-step API (original module semantics: x is (B, 1, input_dim)) ---
    x_single = xs[0][:, None, :]
    lp1, h1new = streaming_sight_forward(x_single, h, params)
    jax.block_until_ready(lp1)
    ref_lp1, ref_h1 = _ref_step(xs[0], h, params)
    assert jnp.allclose(lp1, ref_lp1, atol=1e-4, rtol=1e-4)
    for a, b in zip(h1new, ref_h1):
        assert jnp.allclose(a, b, atol=1e-4, rtol=1e-4)

    print("KERNEL_OK")
</pallas_src>

<mosaic_0001>
module attributes {stable_mosaic.version = 11 : i64} {
  func.func @_streaming_sight_kernel(%arg0: i32, %arg1: memref<8x8x32xf32, #tpu.memory_space<vmem>>, %arg2: memref<8x32xf32, #tpu.memory_space<vmem>>, %arg3: memref<8x32xf32, #tpu.memory_space<vmem>>, %arg4: memref<8x32xf32, #tpu.memory_space<vmem>>, %arg5: memref<32x32xf32, #tpu.memory_space<vmem>>, %arg6: memref<32x32xf32, #tpu.memory_space<vmem>>, %arg7: memref<1x32xf32, #tpu.memory_space<vmem>>, %arg8: memref<32x32xf32, #tpu.memory_space<vmem>>, %arg9: memref<32x32xf32, #tpu.memory_space<vmem>>, %arg10: memref<1x32xf32, #tpu.memory_space<vmem>>, %arg11: memref<32x32xf32, #tpu.memory_space<vmem>>, %arg12: memref<32x32xf32, #tpu.memory_space<vmem>>, %arg13: memref<1x32xf32, #tpu.memory_space<vmem>>, %arg14: memref<32x128xf32, #tpu.memory_space<vmem>>, %arg15: memref<1x128xf32, #tpu.memory_space<vmem>>, %arg16: memref<8x8x128xf32, #tpu.memory_space<vmem>>, %arg17: memref<8x32xf32, #tpu.memory_space<vmem>>, %arg18: memref<8x32xf32, #tpu.memory_space<vmem>>, %arg19: memref<8x32xf32, #tpu.memory_space<vmem>>) attributes {dimension_semantics = [#tpu.dimension_semantics<arbitrary>], iteration_bounds = array<i64: 1>, scalar_prefetch = 0 : i64, scratch_operands = 0 : i64, tpu.core_type = #tpu.core_type<tc>, window_params = [{transform_indices = @transform_0, window_bounds = array<i64: 8, 8, 32>}, {pipeline_mode = #tpu.pipeline_mode<synchronous>, transform_indices = @transform_1, window_bounds = array<i64: 8, 32>}, {pipeline_mode = #tpu.pipeline_mode<synchronous>, transform_indices = @transform_2, window_bounds = array<i64: 8, 32>}, {pipeline_mode = #tpu.pipeline_mode<synchronous>, transform_indices = @transform_3, window_bounds = array<i64: 8, 32>}, {pipeline_mode = #tpu.pipeline_mode<synchronous>, transform_indices = @transform_4, window_bounds = array<i64: 32, 32>}, {pipeline_mode = #tpu.pipeline_mode<synchronous>, transform_indices = @transform_5, window_bounds = array<i64: 32, 32>}, {pipeline_mode = #tpu.pipeline_mode<synchronous>, transform_indices = @transform_6, window_bounds = array<i64: 1, 32>}, {pipeline_mode = #tpu.pipeline_mode<synchronous>, transform_indices = @transform_7, window_bounds = array<i64: 32, 32>}, {pipeline_mode = #tpu.pipeline_mode<synchronous>, transform_indices = @transform_8, window_bounds = array<i64: 32, 32>}, {pipeline_mode = #tpu.pipeline_mode<synchronous>, transform_indices = @transform_9, window_bounds = array<i64: 1, 32>}, {pipeline_mode = #tpu.pipeline_mode<synchronous>, transform_indices = @transform_10, window_bounds = array<i64: 32, 32>}, {pipeline_mode = #tpu.pipeline_mode<synchronous>, transform_indices = @transform_11, window_bounds = array<i64: 32, 32>}, {pipeline_mode = #tpu.pipeline_mode<synchronous>, transform_indices = @transform_12, window_bounds = array<i64: 1, 32>}, {pipeline_mode = #tpu.pipeline_mode<synchronous>, transform_indices = @transform_13, window_bounds = array<i64: 32, 128>}, {pipeline_mode = #tpu.pipeline_mode<synchronous>, transform_indices = @transform_14, window_bounds = array<i64: 1, 128>}, {transform_indices = @transform_15, window_bounds = array<i64: 8, 8, 128>}, {pipeline_mode = #tpu.pipeline_mode<synchronous>, transform_indices = @transform_16, window_bounds = array<i64: 8, 32>}, {pipeline_mode = #tpu.pipeline_mode<synchronous>, transform_indices = @transform_17, window_bounds = array<i64: 8, 32>}, {pipeline_mode = #tpu.pipeline_mode<synchronous>, transform_indices = @transform_18, window_bounds = array<i64: 8, 32>}]} {
    %c0 = arith.constant 0 : index
    %c0_0 = arith.constant 0 : index
    %0 = vector.load %arg5[%c0, %c0_0] : memref<32x32xf32, #tpu.memory_space<vmem>>, vector<32x32xf32>
    %c0_1 = arith.constant 0 : index
    %c0_2 = arith.constant 0 : index
    %1 = vector.load %arg6[%c0_1, %c0_2] : memref<32x32xf32, #tpu.memory_space<vmem>>, vector<32x32xf32>
    %c0_3 = arith.constant 0 : index
    %c0_4 = arith.constant 0 : index
    %2 = vector.load %arg8[%c0_3, %c0_4] : memref<32x32xf32, #tpu.memory_space<vmem>>, vector<32x32xf32>
    %c0_5 = arith.constant 0 : index
    %c0_6 = arith.constant 0 : index
    %3 = vector.load %arg9[%c0_5, %c0_6] : memref<32x32xf32, #tpu.memory_space<vmem>>, vector<32x32xf32>
    %c0_7 = arith.constant 0 : index
    %c0_8 = arith.constant 0 : index
    %4 = vector.load %arg11[%c0_7, %c0_8] : memref<32x32xf32, #tpu.memory_space<vmem>>, vector<32x32xf32>
    %c0_9 = arith.constant 0 : index
    %c0_10 = arith.constant 0 : index
    %5 = vector.load %arg12[%c0_9, %c0_10] : memref<32x32xf32, #tpu.memory_space<vmem>>, vector<32x32xf32>
    %c0_11 = arith.constant 0 : index
    %c0_12 = arith.constant 0 : index
    %6 = vector.load %arg14[%c0_11, %c0_12] : memref<32x128xf32, #tpu.memory_space<vmem>>, vector<32x128xf32>
    %c0_13 = arith.constant 0 : index
    %c0_14 = arith.constant 0 : index
    %7 = vector.load %arg7[%c0_13, %c0_14] : memref<1x32xf32, #tpu.memory_space<vmem>>, vector<1x32xf32>
    %8 = vector.shape_cast %7 : vector<1x32xf32> to vector<1x32xf32>
    %9 = vector.broadcast %8 : vector<1x32xf32> to vector<8x32xf32>
    %c0_15 = arith.constant 0 : index
    %c0_16 = arith.constant 0 : index
    %10 = vector.load %arg10[%c0_15, %c0_16] : memref<1x32xf32, #tpu.memory_space<vmem>>, vector<1x32xf32>
    %11 = vector.shape_cast %10 : vector<1x32xf32> to vector<1x32xf32>
    %12 = vector.broadcast %11 : vector<1x32xf32> to vector<8x32xf32>
    %c0_17 = arith.constant 0 : index
    %c0_18 = arith.constant 0 : index
    %13 = vector.load %arg13[%c0_17, %c0_18] : memref<1x32xf32, #tpu.memory_space<vmem>>, vector<1x32xf32>
    %14 = vector.shape_cast %13 : vector<1x32xf32> to vector<1x32xf32>
    %15 = vector.broadcast %14 : vector<1x32xf32> to vector<8x32xf32>
    %c0_19 = arith.constant 0 : index
    %c0_20 = arith.constant 0 : index
    %16 = vector.load %arg15[%c0_19, %c0_20] : memref<1x128xf32, #tpu.memory_space<vmem>>, vector<1x128xf32>
    %17 = vector.shape_cast %16 : vector<1x128xf32> to vector<1x128xf32>
    %18 = vector.broadcast %17 : vector<1x128xf32> to vector<8x128xf32>
    %c0_i32 = arith.constant 0 : i32
    %19 = arith.cmpi eq, %arg0, %c0_i32 : i32
    %20 = arith.extui %19 : i1 to i32
    %c0_i32_21 = arith.constant 0 : i32
    %21 = arith.cmpi ne, %20, %c0_i32_21 : i32
    scf.if %21 {
      %c0_162 = arith.constant 0 : index
      %c0_163 = arith.constant 0 : index
      %332 = vector.load %arg2[%c0_162, %c0_163] : memref<8x32xf32, #tpu.memory_space<vmem>>, vector<8x32xf32>
      %c0_164 = arith.constant 0 : index
      %c0_165 = arith.constant 0 : index
      %333 = vector.load %arg17[%c0_164, %c0_165] : memref<8x32xf32, #tpu.memory_space<vmem>>, vector<8x32xf32>
      tpu.vector_store %arg17[%c0_164, %c0_165], %332 {strides = array<i32>} : memref<8x32xf32, #tpu.memory_space<vmem>>, vector<8x32xf32>,
      %c0_166 = arith.constant 0 : index
      %c0_167 = arith.constant 0 : index
      %334 = vector.load %arg3[%c0_166, %c0_167] : memref<8x32xf32, #tpu.memory_space<vmem>>, vector<8x32xf32>
      %c0_168 = arith.constant 0 : index
      %c0_169 = arith.constant 0 : index
      %335 = vector.load %arg18[%c0_168, %c0_169] : memref<8x32xf32, #tpu.memory_space<vmem>>, vector<8x32xf32>
      tpu.vector_store %arg18[%c0_168, %c0_169], %334 {strides = array<i32>} : memref<8x32xf32, #tpu.memory_space<vmem>>, vector<8x32xf32>,
      %c0_170 = arith.constant 0 : index
      %c0_171 = arith.constant 0 : index
      %336 = vector.load %arg4[%c0_170, %c0_171] : memref<8x32xf32, #tpu.memory_space<vmem>>, vector<8x32xf32>
      %c0_172 = arith.constant 0 : index
      %c0_173 = arith.constant 0 : index
      %337 = vector.load %arg19[%c0_172, %c0_173] : memref<8x32xf32, #tpu.memory_space<vmem>>, vector<8x32xf32>
      tpu.vector_store %arg19[%c0_172, %c0_173], %336 {strides = array<i32>} : memref<8x32xf32, #tpu.memory_space<vmem>>, vector<8x32xf32>,
    } else {
    }
    %c0_22 = arith.constant 0 : index
    %c0_23 = arith.constant 0 : index
    %22 = vector.load %arg17[%c0_22, %c0_23] : memref<8x32xf32, #tpu.memory_space<vmem>>, vector<8x32xf32>
    %c0_24 = arith.constant 0 : index
    %c0_25 = arith.constant 0 : index
    %23 = vector.load %arg18[%c0_24, %c0_25] : memref<8x32xf32, #tpu.memory_space<vmem>>, vector<8x32xf32>
    %c0_26 = arith.constant 0 : index
    %c0_27 = arith.constant 0 : index
    %24 = vector.load %arg19[%c0_26, %c0_27] : memref<8x32xf32, #tpu.memory_space<vmem>>, vector<8x32xf32>
    %c0_i32_28 = arith.constant 0 : i32
    %25 = arith.index_cast %c0_i32_28 : i32 to index
    %c0_29 = arith.constant 0 : index
    %c0_30 = arith.constant 0 : index
    %26 = vector.load %arg1[%25, %c0_29, %c0_30] : memref<8x8x32xf32, #tpu.memory_space<vmem>>, vector<1x8x32xf32>
    %27 = vector.shape_cast %26 : vector<1x8x32xf32> to vector<8x32xf32>
    %cst = arith.constant dense<0.000000e+00> : vector<8x32xf32>
    %28 = tpu.matmul %27, %0, %cst {dimension_numbers = #tpu.dot_dimension_numbers<[1], [0], [0], [1], [0, 0, 1, 1], [], []>} : vector<8x32xf32>, vector<32x32xf32>, vector<8x32xf32> -> vector<8x32xf32>
    %cst_31 = arith.constant dense<0.000000e+00> : vector<8x32xf32>
    %29 = tpu.matmul %22, %1, %cst_31 {dimension_numbers = #tpu.dot_dimension_numbers<[1], [0], [0], [1], [0, 0, 1, 1], [], []>} : vector<8x32xf32>, vector<32x32xf32>, vector<8x32xf32> -> vector<8x32xf32>
    %30 = arith.addf %28, %29 : vector<8x32xf32>
    %31 = arith.addf %30, %9 : vector<8x32xf32>
    %cst_32 = arith.constant 0.000000e+00 : f32
    %32 = vector.broadcast %cst_32 : f32 to vector<8x32xf32>
    %33 = arith.maximumf %31, %32 : vector<8x32xf32>
    %cst_33 = arith.constant dense<0.000000e+00> : vector<8x32xf32>
    %34 = tpu.matmul %33, %2, %cst_33 {dimension_numbers = #tpu.dot_dimension_numbers<[1], [0], [0], [1], [0, 0, 1, 1], [], []>} : vector<8x32xf32>, vector<32x32xf32>, vector<8x32xf32> -> vector<8x32xf32>
    %cst_34 = arith.constant dense<0.000000e+00> : vector<8x32xf32>
    %35 = tpu.matmul %23, %3, %cst_34 {dimension_numbers = #tpu.dot_dimension_numbers<[1], [0], [0], [1], [0, 0, 1, 1], [], []>} : vector<8x32xf32>, vector<32x32xf32>, vector<8x32xf32> -> vector<8x32xf32>
    %36 = arith.addf %34, %35 : vector<8x32xf32>
    %37 = arith.addf %36, %12 : vector<8x32xf32>
    %cst_35 = arith.constant 0.000000e+00 : f32
    %38 = vector.broadcast %cst_35 : f32 to vector<8x32xf32>
    %39 = arith.maximumf %37, %38 : vector<8x32xf32>
    %cst_36 = arith.constant dense<0.000000e+00> : vector<8x32xf32>
    %40 = tpu.matmul %39, %4, %cst_36 {dimension_numbers = #tpu.dot_dimension_numbers<[1], [0], [0], [1], [0, 0, 1, 1], [], []>} : vector<8x32xf32>, vector<32x32xf32>, vector<8x32xf32> -> vector<8x32xf32>
    %cst_37 = arith.constant dense<0.000000e+00> : vector<8x32xf32>
    %41 = tpu.matmul %24, %5, %cst_37 {dimension_numbers = #tpu.dot_dimension_numbers<[1], [0], [0], [1], [0, 0, 1, 1], [], []>} : vector<8x32xf32>, vector<32x32xf32>, vector<8x32xf32> -> vector<8x32xf32>
    %42 = arith.addf %40, %41 : vector<8x32xf32>
    %43 = arith.addf %42, %15 : vector<8x32xf32>
    %cst_38 = arith.constant 0.000000e+00 : f32
    %44 = vector.broadcast %cst_38 : f32 to vector<8x32xf32>
    %45 = arith.maximumf %43, %44 : vector<8x32xf32>
    %cst_39 = arith.constant dense<0.000000e+00> : vector<8x128xf32>
    %46 = tpu.matmul %45, %6, %cst_39 {dimension_numbers = #tpu.dot_dimension_numbers<[1], [0], [0], [1], [0, 0, 1, 1], [], []>} : vector<8x32xf32>, vector<32x128xf32>, vector<8x128xf32> -> vector<8x128xf32>
    %47 = arith.addf %46, %18 : vector<8x128xf32>
    %cst_40 = arith.constant dense<0xFF800000> : vector<8xf32>
    %48 = vector.multi_reduction <maximumf>, %47, %cst_40 [1] : vector<8x128xf32> to vector<8xf32>
    %49 = vector.shape_cast %48 : vector<8xf32> to vector<8x1xf32>
    %50 = vector.broadcast %49 : vector<8x1xf32> to vector<8x128xf32>
    %51 = arith.subf %47, %50 : vector<8x128xf32>
    %52 = math.exp %51 : vector<8x128xf32>
    %cst_41 = arith.constant dense<0.000000e+00> : vector<8xf32>
    %53 = vector.multi_reduction <add>, %52, %cst_41 [1] : vector<8x128xf32> to vector<8xf32>
    %54 = vector.shape_cast %53 : vector<8xf32> to vector<8x1xf32>
    %55 = math.log %54 : vector<8x1xf32>
    %56 = arith.addf %55, %49 : vector<8x1xf32>
    %57 = vector.broadcast %56 : vector<8x1xf32> to vector<8x128xf32>
    %58 = arith.subf %47, %57 : vector<8x128xf32>
    %59 = arith.index_cast %c0_i32_28 : i32 to index
    %c0_42 = arith.constant 0 : index
    %c0_43 = arith.constant 0 : index
    %60 = vector.load %arg16[%59, %c0_42, %c0_43] : memref<8x8x128xf32, #tpu.memory_space<vmem>>, vector<1x8x128xf32>
    %61 = vector.shape_cast %60 : vector<1x8x128xf32> to vector<8x128xf32>
    %62 = vector.shape_cast %58 : vector<8x128xf32> to vector<1x8x128xf32>
    tpu.vector_store %arg16[%59, %c0_42, %c0_43], %62 {strides = array<i32>} : memref<8x8x128xf32, #tpu.memory_space<vmem>>, vector<1x8x128xf32>,
    %c1_i32 = arith.constant 1 : i32
    %63 = arith.index_cast %c1_i32 : i32 to index
    %c0_44 = arith.constant 0 : index
    %c0_45 = arith.constant 0 : index
    %64 = vector.load %arg1[%63, %c0_44, %c0_45] : memref<8x8x32xf32, #tpu.memory_space<vmem>>, vector<1x8x32xf32>
    %65 = vector.shape_cast %64 : vector<1x8x32xf32> to vector<8x32xf32>
    %cst_46 = arith.constant dense<0.000000e+00> : vector<8x32xf32>
    %66 = tpu.matmul %65, %0, %cst_46 {dimension_numbers = #tpu.dot_dimension_numbers<[1], [0], [0], [1], [0, 0, 1, 1], [], []>} : vector<8x32xf32>, vector<32x32xf32>, vector<8x32xf32> -> vector<8x32xf32>
    %cst_47 = arith.constant dense<0.000000e+00> : vector<8x32xf32>
    %67 = tpu.matmul %33, %1, %cst_47 {dimension_numbers = #tpu.dot_dimension_numbers<[1], [0], [0], [1], [0, 0, 1, 1], [], []>} : vector<8x32xf32>, vector<32x32xf32>, vector<8x32xf32> -> vector<8x32xf32>
    %68 = arith.addf %66, %67 : vector<8x32xf32>
    %69 = arith.addf %68, %9 : vector<8x32xf32>
    %cst_48 = arith.constant 0.000000e+00 : f32
    %70 = vector.broadcast %cst_48 : f32 to vector<8x32xf32>
    %71 = arith.maximumf %69, %70 : vector<8x32xf32>
    %cst_49 = arith.constant dense<0.000000e+00> : vector<8x32xf32>
    %72 = tpu.matmul %71, %2, %cst_49 {dimension_numbers = #tpu.dot_dimension_numbers<[1], [0], [0], [1], [0, 0, 1, 1], [], []>} : vector<8x32xf32>, vector<32x32xf32>, vector<8x32xf32> -> vector<8x32xf32>
    %cst_50 = arith.constant dense<0.000000e+00> : vector<8x32xf32>
    %73 = tpu.matmul %39, %3, %cst_50 {dimension_numbers = #tpu.dot_dimension_numbers<[1], [0], [0], [1], [0, 0, 1, 1], [], []>} : vector<8x32xf32>, vector<32x32xf32>, vector<8x32xf32> -> vector<8x32xf32>
    %74 = arith.addf %72, %73 : vector<8x32xf32>
    %75 = arith.addf %74, %12 : vector<8x32xf32>
    %cst_51 = arith.constant 0.000000e+00 : f32
    %76 = vector.broadcast %cst_51 : f32 to vector<8x32xf32>
    %77 = arith.maximumf %75, %76 : vector<8x32xf32>
    %cst_52 = arith.constant dense<0.000000e+00> : vector<8x32xf32>
    %78 = tpu.matmul %77, %4, %cst_52 {dimension_numbers = #tpu.dot_dimension_numbers<[1], [0], [0], [1], [0, 0, 1, 1], [], []>} : vector<8x32xf32>, vector<32x32xf32>, vector<8x32xf32> -> vector<8x32xf32>
    %cst_53 = arith.constant dense<0.000000e+00> : vector<8x32xf32>
    %79 = tpu.matmul %45, %5, %cst_53 {dimension_numbers = #tpu.dot_dimension_numbers<[1], [0], [0], [1], [0, 0, 1, 1], [], []>} : vector<8x32xf32>, vector<32x32xf32>, vector<8x32xf32> -> vector<8x32xf32>
    %80 = arith.addf %78, %79 : vector<8x32xf32>
    %81 = arith.addf %80, %15 : vector<8x32xf32>
    %cst_54 = arith.constant 0.000000e+00 : f32
    %82 = vector.broadcast %cst_54 : f32 to vector<8x32xf32>
    %83 = arith.maximumf %81, %82 : vector<8x32xf32>
    %cst_55 = arith.constant dense<0.000000e+00> : vector<8x128xf32>
    %84 = tpu.matmul %83, %6, %cst_55 {dimension_numbers = #tpu.dot_dimension_numbers<[1], [0], [0], [1], [0, 0, 1, 1], [], []>} : vector<8x32xf32>, vector<32x128xf32>, vector<8x128xf32> -> vector<8x128xf32>
    %85 = arith.addf %84, %18 : vector<8x128xf32>
    %cst_56 = arith.constant dense<0xFF800000> : vector<8xf32>
    %86 = vector.multi_reduction <maximumf>, %85, %cst_56 [1] : vector<8x128xf32> to vector<8xf32>
    %87 = vector.shape_cast %86 : vector<8xf32> to vector<8x1xf32>
    %88 = vector.broadcast %87 : vector<8x1xf32> to vector<8x128xf32>
    %89 = arith.subf %85, %88 : vector<8x128xf32>
    %90 = math.exp %89 : vector<8x128xf32>
    %cst_57 = arith.constant dense<0.000000e+00> : vector<8xf32>
    %91 = vector.multi_reduction <add>, %90, %cst_57 [1] : vector<8x128xf32> to vector<8xf32>
    %92 = vector.shape_cast %91 : vector<8xf32> to vector<8x1xf32>
    %93 = math.log %92 : vector<8x1xf32>
    %94 = arith.addf %93, %87 : vector<8x1xf32>
    %95 = vector.broadcast %94 : vector<8x1xf32> to vector<8x128xf32>
    %96 = arith.subf %85, %95 : vector<8x128xf32>
    %97 = arith.index_cast %c1_i32 : i32 to index
    %c0_58 = arith.constant 0 : index
    %c0_59 = arith.constant 0 : index
    %98 = vector.load %arg16[%97, %c0_58, %c0_59] : memref<8x8x128xf32, #tpu.memory_space<vmem>>, vector<1x8x128xf32>
    %99 = vector.shape_cast %98 : vector<1x8x128xf32> to vector<8x128xf32>
    %100 = vector.shape_cast %96 : vector<8x128xf32> to vector<1x8x128xf32>
    tpu.vector_store %arg16[%97, %c0_58, %c0_59], %100 {strides = array<i32>} : memref<8x8x128xf32, #tpu.memory_space<vmem>>, vector<1x8x128xf32>,
    %c2_i32 = arith.constant 2 : i32
    %101 = arith.index_cast %c2_i32 : i32 to index
    %c0_60 = arith.constant 0 : index
    %c0_61 = arith.constant 0 : index
    %102 = vector.load %arg1[%101, %c0_60, %c0_61] : memref<8x8x32xf32, #tpu.memory_space<vmem>>, vector<1x8x32xf32>
    %103 = vector.shape_cast %102 : vector<1x8x32xf32> to vector<8x32xf32>
    %cst_62 = arith.constant dense<0.000000e+00> : vector<8x32xf32>
    %104 = tpu.matmul %103, %0, %cst_62 {dimension_numbers = #tpu.dot_dimension_numbers<[1], [0], [0], [1], [0, 0, 1, 1], [], []>} : vector<8x32xf32>, vector<32x32xf32>, vector<8x32xf32> -> vector<8x32xf32>
    %cst_63 = arith.constant dense<0.000000e+00> : vector<8x32xf32>
    %105 = tpu.matmul %71, %1, %cst_63 {dimension_numbers = #tpu.dot_dimension_numbers<[1], [0], [0], [1], [0, 0, 1, 1], [], []>} : vector<8x32xf32>, vector<32x32xf32>, vector<8x32xf32> -> vector<8x32xf32>
    %106 = arith.addf %104, %105 : vector<8x32xf32>
    %107 = arith.addf %106, %9 : vector<8x32xf32>
    %cst_64 = arith.constant 0.000000e+00 : f32
    %108 = vector.broadcast %cst_64 : f32 to vector<8x32xf32>
    %109 = arith.maximumf %107, %108 : vector<8x32xf32>
    %cst_65 = arith.constant dense<0.000000e+00> : vector<8x32xf32>
    %110 = tpu.matmul %109, %2, %cst_65 {dimension_numbers = #tpu.dot_dimension_numbers<[1], [0], [0], [1], [0, 0, 1, 1], [], []>} : vector<8x32xf32>, vector<32x32xf32>, vector<8x32xf32> -> vector<8x32xf32>
    %cst_66 = arith.constant dense<0.000000e+00> : vector<8x32xf32>
    %111 = tpu.matmul %77, %3, %cst_66 {dimension_numbers = #tpu.dot_dimension_numbers<[1], [0], [0], [1], [0, 0, 1, 1], [], []>} : vector<8x32xf32>, vector<32x32xf32>, vector<8x32xf32> -> vector<8x32xf32>
    %112 = arith.addf %110, %111 : vector<8x32xf32>
    %113 = arith.addf %112, %12 : vector<8x32xf32>
    %cst_67 = arith.constant 0.000000e+00 : f32
    %114 = vector.broadcast %cst_67 : f32 to vector<8x32xf32>
    %115 = arith.maximumf %113, %114 : vector<8x32xf32>
    %cst_68 = arith.constant dense<0.000000e+00> : vector<8x32xf32>
    %116 = tpu.matmul %115, %4, %cst_68 {dimension_numbers = #tpu.dot_dimension_numbers<[1], [0], [0], [1], [0, 0, 1, 1], [], []>} : vector<8x32xf32>, vector<32x32xf32>, vector<8x32xf32> -> vector<8x32xf32>
    %cst_69 = arith.constant dense<0.000000e+00> : vector<8x32xf32>
    %117 = tpu.matmul %83, %5, %cst_69 {dimension_numbers = #tpu.dot_dimension_numbers<[1], [0], [0], [1], [0, 0, 1, 1], [], []>} : vector<8x32xf32>, vector<32x32xf32>, vector<8x32xf32> -> vector<8x32xf32>
    %118 = arith.addf %116, %117 : vector<8x32xf32>
    %119 = arith.addf %118, %15 : vector<8x32xf32>
    %cst_70 = arith.constant 0.000000e+00 : f32
    %120 = vector.broadcast %cst_70 : f32 to vector<8x32xf32>
    %121 = arith.maximumf %119, %120 : vector<8x32xf32>
    %cst_71 = arith.constant dense<0.000000e+00> : vector<8x128xf32>
    %122 = tpu.matmul %121, %6, %cst_71 {dimension_numbers = #tpu.dot_dimension_numbers<[1], [0], [0], [1], [0, 0, 1, 1], [], []>} : vector<8x32xf32>, vector<32x128xf32>, vector<8x128xf32> -> vector<8x128xf32>
    %123 = arith.addf %122, %18 : vector<8x128xf32>
    %cst_72 = arith.constant dense<0xFF800000> : vector<8xf32>
    %124 = vector.multi_reduction <maximumf>, %123, %cst_72 [1] : vector<8x128xf32> to vector<8xf32>
    %125 = vector.shape_cast %124 : vector<8xf32> to vector<8x1xf32>
    %126 = vector.broadcast %125 : vector<8x1xf32> to vector<8x128xf32>
    %127 = arith.subf %123, %126 : vector<8x128xf32>
    %128 = math.exp %127 : vector<8x128xf32>
    %cst_73 = arith.constant dense<0.000000e+00> : vector<8xf32>
    %129 = vector.multi_reduction <add>, %128, %cst_73 [1] : vector<8x128xf32> to vector<8xf32>
    %130 = vector.shape_cast %129 : vector<8xf32> to vector<8x1xf32>
    %131 = math.log %130 : vector<8x1xf32>
    %132 = arith.addf %131, %125 : vector<8x1xf32>
    %133 = vector.broadcast %132 : vector<8x1xf32> to vector<8x128xf32>
    %134 = arith.subf %123, %133 : vector<8x128xf32>
    %135 = arith.index_cast %c2_i32 : i32 to index
    %c0_74 = arith.constant 0 : index
    %c0_75 = arith.constant 0 : index
    %136 = vector.load %arg16[%135, %c0_74, %c0_75] : memref<8x8x128xf32, #tpu.memory_space<vmem>>, vector<1x8x128xf32>
    %137 = vector.shape_cast %136 : vector<1x8x128xf32> to vector<8x128xf32>
    %138 = vector.shape_cast %134 : vector<8x128xf32> to vector<1x8x128xf32>
    tpu.vector_store %arg16[%135, %c0_74, %c0_75], %138 {strides = array<i32>} : memref<8x8x128xf32, #tpu.memory_space<vmem>>, vector<1x8x128xf32>,
    %c3_i32 = arith.constant 3 : i32
    %139 = arith.index_cast %c3_i32 : i32 to index
    %c0_76 = arith.constant 0 : index
    %c0_77 = arith.constant 0 : index
    %140 = vector.load %arg1[%139, %c0_76, %c0_77] : memref<8x8x32xf32, #tpu.memory_space<vmem>>, vector<1x8x32xf32>
    %141 = vector.shape_cast %140 : vector<1x8x32xf32> to vector<8x32xf32>
    %cst_78 = arith.constant dense<0.000000e+00> : vector<8x32xf32>
    %142 = tpu.matmul %141, %0, %cst_78 {dimension_numbers = #tpu.dot_dimension_numbers<[1], [0], [0], [1], [0, 0, 1, 1], [], []>} : vector<8x32xf32>, vector<32x32xf32>, vector<8x32xf32> -> vector<8x32xf32>
    %cst_79 = arith.constant dense<0.000000e+00> : vector<8x32xf32>
    %143 = tpu.matmul %109, %1, %cst_79 {dimension_numbers = #tpu.dot_dimension_numbers<[1], [0], [0], [1], [0, 0, 1, 1], [], []>} : vector<8x32xf32>, vector<32x32xf32>, vector<8x32xf32> -> vector<8x32xf32>
    %144 = arith.addf %142, %143 : vector<8x32xf32>
    %145 = arith.addf %144, %9 : vector<8x32xf32>
    %cst_80 = arith.constant 0.000000e+00 : f32
    %146 = vector.broadcast %cst_80 : f32 to vector<8x32xf32>
    %147 = arith.maximumf %145, %146 : vector<8x32xf32>
    %cst_81 = arith.constant dense<0.000000e+00> : vector<8x32xf32>
    %148 = tpu.matmul %147, %2, %cst_81 {dimension_numbers = #tpu.dot_dimension_numbers<[1], [0], [0], [1], [0, 0, 1, 1], [], []>} : vector<8x32xf32>, vector<32x32xf32>, vector<8x32xf32> -> vector<8x32xf32>
    %cst_82 = arith.constant dense<0.000000e+00> : vector<8x32xf32>
    %149 = tpu.matmul %115, %3, %cst_82 {dimension_numbers = #tpu.dot_dimension_numbers<[1], [0], [0], [1], [0, 0, 1, 1], [], []>} : vector<8x32xf32>, vector<32x32xf32>, vector<8x32xf32> -> vector<8x32xf32>
    %150 = arith.addf %148, %149 : vector<8x32xf32>
    %151 = arith.addf %150, %12 : vector<8x32xf32>
    %cst_83 = arith.constant 0.000000e+00 : f32
    %152 = vector.broadcast %cst_83 : f32 to vector<8x32xf32>
    %153 = arith.maximumf %151, %152 : vector<8x32xf32>
    %cst_84 = arith.constant dense<0.000000e+00> : vector<8x32xf32>
    %154 = tpu.matmul %153, %4, %cst_84 {dimension_numbers = #tpu.dot_dimension_numbers<[1], [0], [0], [1], [0, 0, 1, 1], [], []>} : vector<8x32xf32>, vector<32x32xf32>, vector<8x32xf32> -> vector<8x32xf32>
    %cst_85 = arith.constant dense<0.000000e+00> : vector<8x32xf32>
    %155 = tpu.matmul %121, %5, %cst_85 {dimension_numbers = #tpu.dot_dimension_numbers<[1], [0], [0], [1], [0, 0, 1, 1], [], []>} : vector<8x32xf32>, vector<32x32xf32>, vector<8x32xf32> -> vector<8x32xf32>
    %156 = arith.addf %154, %155 : vector<8x32xf32>
    %157 = arith.addf %156, %15 : vector<8x32xf32>
    %cst_86 = arith.constant 0.000000e+00 : f32
    %158 = vector.broadcast %cst_86 : f32 to vector<8x32xf32>
    %159 = arith.maximumf %157, %158 : vector<8x32xf32>
    %cst_87 = arith.constant dense<0.000000e+00> : vector<8x128xf32>
    %160 = tpu.matmul %159, %6, %cst_87 {dimension_numbers = #tpu.dot_dimension_numbers<[1], [0], [0], [1], [0, 0, 1, 1], [], []>} : vector<8x32xf32>, vector<32x128xf32>, vector<8x128xf32> -> vector<8x128xf32>
    %161 = arith.addf %160, %18 : vector<8x128xf32>
    %cst_88 = arith.constant dense<0xFF800000> : vector<8xf32>
    %162 = vector.multi_reduction <maximumf>, %161, %cst_88 [1] : vector<8x128xf32> to vector<8xf32>
    %163 = vector.shape_cast %162 : vector<8xf32> to vector<8x1xf32>
    %164 = vector.broadcast %163 : vector<8x1xf32> to vector<8x128xf32>
    %165 = arith.subf %161, %164 : vector<8x128xf32>
    %166 = math.exp %165 : vector<8x128xf32>
    %cst_89 = arith.constant dense<0.000000e+00> : vector<8xf32>
    %167 = vector.multi_reduction <add>, %166, %cst_89 [1] : vector<8x128xf32> to vector<8xf32>
    %168 = vector.shape_cast %167 : vector<8xf32> to vector<8x1xf32>
    %169 = math.log %168 : vector<8x1xf32>
    %170 = arith.addf %169, %163 : vector<8x1xf32>
    %171 = vector.broadcast %170 : vector<8x1xf32> to vector<8x128xf32>
    %172 = arith.subf %161, %171 : vector<8x128xf32>
    %173 = arith.index_cast %c3_i32 : i32 to index
    %c0_90 = arith.constant 0 : index
    %c0_91 = arith.constant 0 : index
    %174 = vector.load %arg16[%173, %c0_90, %c0_91] : memref<8x8x128xf32, #tpu.memory_space<vmem>>, vector<1x8x128xf32>
    %175 = vector.shape_cast %174 : vector<1x8x128xf32> to vector<8x128xf32>
    %176 = vector.shape_cast %172 : vector<8x128xf32> to vector<1x8x128xf32>
    tpu.vector_store %arg16[%173, %c0_90, %c0_91], %176 {strides = array<i32>} : memref<8x8x128xf32, #tpu.memory_space<vmem>>, vector<1x8x128xf32>,
    %c4_i32 = arith.constant 4 : i32
    %177 = arith.index_cast %c4_i32 : i32 to index
    %c0_92 = arith.constant 0 : index
    %c0_93 = arith.constant 0 : index
    %178 = vector.load %arg1[%177, %c0_92, %c0_93] : memref<8x8x32xf32, #tpu.memory_space<vmem>>, vector<1x8x32xf32>
    %179 = vector.shape_cast %178 : vector<1x8x32xf32> to vector<8x32xf32>
    %cst_94 = arith.constant dense<0.000000e+00> : vector<8x32xf32>
    %180 = tpu.matmul %179, %0, %cst_94 {dimension_numbers = #tpu.dot_dimension_numbers<[1], [0], [0], [1], [0, 0, 1, 1], [], []>} : vector<8x32xf32>, vector<32x32xf32>, vector<8x32xf32> -> vector<8x32xf32>
    %cst_95 = arith.constant dense<0.000000e+00> : vector<8x32xf32>
    %181 = tpu.matmul %147, %1, %cst_95 {dimension_numbers = #tpu.dot_dimension_numbers<[1], [0], [0], [1], [0, 0, 1, 1], [], []>} : vector<8x32xf32>, vector<32x32xf32>, vector<8x32xf32> -> vector<8x32xf32>
    %182 = arith.addf %180, %181 : vector<8x32xf32>
    %183 = arith.addf %182, %9 : vector<8x32xf32>
    %cst_96 = arith.constant 0.000000e+00 : f32
    %184 = vector.broadcast %cst_96 : f32 to vector<8x32xf32>
    %185 = arith.maximumf %183, %184 : vector<8x32xf32>
    %cst_97 = arith.constant dense<0.000000e+00> : vector<8x32xf32>
    %186 = tpu.matmul %185, %2, %cst_97 {dimension_numbers = #tpu.dot_dimension_numbers<[1], [0], [0], [1], [0, 0, 1, 1], [], []>} : vector<8x32xf32>, vector<32x32xf32>, vector<8x32xf32> -> vector<8x32xf32>
    %cst_98 = arith.constant dense<0.000000e+00> : vector<8x32xf32>
    %187 = tpu.matmul %153, %3, %cst_98 {dimension_numbers = #tpu.dot_dimension_numbers<[1], [0], [0], [1], [0, 0, 1, 1], [], []>} : vector<8x32xf32>, vector<32x32xf32>, vector<8x32xf32> -> vector<8x32xf32>
    %188 = arith.addf %186, %187 : vector<8x32xf32>
    %189 = arith.addf %188, %12 : vector<8x32xf32>
    %cst_99 = arith.constant 0.000000e+00 : f32
    %190 = vector.broadcast %cst_99 : f32 to vector<8x32xf32>
    %191 = arith.maximumf %189, %190 : vector<8x32xf32>
    %cst_100 = arith.constant dense<0.000000e+00> : vector<8x32xf32>
    %192 = tpu.matmul %191, %4, %cst_100 {dimension_numbers = #tpu.dot_dimension_numbers<[1], [0], [0], [1], [0, 0, 1, 1], [], []>} : vector<8x32xf32>, vector<32x32xf32>, vector<8x32xf32> -> vector<8x32xf32>
    %cst_101 = arith.constant dense<0.000000e+00> : vector<8x32xf32>
    %193 = tpu.matmul %159, %5, %cst_101 {dimension_numbers = #tpu.dot_dimension_numbers<[1], [0], [0], [1], [0, 0, 1, 1], [], []>} : vector<8x32xf32>, vector<32x32xf32>, vector<8x32xf32> -> vector<8x32xf32>
    %194 = arith.addf %192, %193 : vector<8x32xf32>
    %195 = arith.addf %194, %15 : vector<8x32xf32>
    %cst_102 = arith.constant 0.000000e+00 : f32
    %196 = vector.broadcast %cst_102 : f32 to vector<8x32xf32>
    %197 = arith.maximumf %195, %196 : vector<8x32xf32>
    %cst_103 = arith.constant dense<0.000000e+00> : vector<8x128xf32>
    %198 = tpu.matmul %197, %6, %cst_103 {dimension_numbers = #tpu.dot_dimension_numbers<[1], [0], [0], [1], [0, 0, 1, 1], [], []>} : vector<8x32xf32>, vector<32x128xf32>, vector<8x128xf32> -> vector<8x128xf32>
    %199 = arith.addf %198, %18 : vector<8x128xf32>
    %cst_104 = arith.constant dense<0xFF800000> : vector<8xf32>
    %200 = vector.multi_reduction <maximumf>, %199, %cst_104 [1] : vector<8x128xf32> to vector<8xf32>
    %201 = vector.shape_cast %200 : vector<8xf32> to vector<8x1xf32>
    %202 = vector.broadcast %201 : vector<8x1xf32> to vector<8x128xf32>
    %203 = arith.subf %199, %202 : vector<8x128xf32>
    %204 = math.exp %203 : vector<8x128xf32>
    %cst_105 = arith.constant dense<0.000000e+00> : vector<8xf32>
    %205 = vector.multi_reduction <add>, %204, %cst_105 [1] : vector<8x128xf32> to vector<8xf32>
    %206 = vector.shape_cast %205 : vector<8xf32> to vector<8x1xf32>
    %207 = math.log %206 : vector<8x1xf32>
    %208 = arith.addf %207, %201 : vector<8x1xf32>
    %209 = vector.broadcast %208 : vector<8x1xf32> to vector<8x128xf32>
    %210 = arith.subf %199, %209 : vector<8x128xf32>
    %211 = arith.index_cast %c4_i32 : i32 to index
    %c0_106 = arith.constant 0 : index
    %c0_107 = arith.constant 0 : index
    %212 = vector.load %arg16[%211, %c0_106, %c0_107] : memref<8x8x128xf32, #tpu.memory_space<vmem>>, vector<1x8x128xf32>
    %213 = vector.shape_cast %212 : vector<1x8x128xf32> to vector<8x128xf32>
    %214 = vector.shape_cast %210 : vector<8x128xf32> to vector<1x8x128xf32>
    tpu.vector_store %arg16[%211, %c0_106, %c0_107], %214 {strides = array<i32>} : memref<8x8x128xf32, #tpu.memory_space<vmem>>, vector<1x8x128xf32>,
    %c5_i32 = arith.constant 5 : i32
    %215 = arith.index_cast %c5_i32 : i32 to index
    %c0_108 = arith.constant 0 : index
    %c0_109 = arith.constant 0 : index
    %216 = vector.load %arg1[%215, %c0_108, %c0_109] : memref<8x8x32xf32, #tpu.memory_space<vmem>>, vector<1x8x32xf32>
    %217 = vector.shape_cast %216 : vector<1x8x32xf32> to vector<8x32xf32>
    %cst_110 = arith.constant dense<0.000000e+00> : vector<8x32xf32>
    %218 = tpu.matmul %217, %0, %cst_110 {dimension_numbers = #tpu.dot_dimension_numbers<[1], [0], [0], [1], [0, 0, 1, 1], [], []>} : vector<8x32xf32>, vector<32x32xf32>, vector<8x32xf32> -> vector<8x32xf32>
    %cst_111 = arith.constant dense<0.000000e+00> : vector<8x32xf32>
    %219 = tpu.matmul %185, %1, %cst_111 {dimension_numbers = #tpu.dot_dimension_numbers<[1], [0], [0], [1], [0, 0, 1, 1], [], []>} : vector<8x32xf32>, vector<32x32xf32>, vector<8x32xf32> -> vector<8x32xf32>
    %220 = arith.addf %218, %219 : vector<8x32xf32>
    %221 = arith.addf %220, %9 : vector<8x32xf32>
    %cst_112 = arith.constant 0.000000e+00 : f32
    %222 = vector.broadcast %cst_112 : f32 to vector<8x32xf32>
    %223 = arith.maximumf %221, %222 : vector<8x32xf32>
    %cst_113 = arith.constant dense<0.000000e+00> : vector<8x32xf32>
    %224 = tpu.matmul %223, %2, %cst_113 {dimension_numbers = #tpu.dot_dimension_numbers<[1], [0], [0], [1], [0, 0, 1, 1], [], []>} : vector<8x32xf32>, vector<32x32xf32>, vector<8x32xf32> -> vector<8x32xf32>
    %cst_114 = arith.constant dense<0.000000e+00> : vector<8x32xf32>
    %225 = tpu.matmul %191, %3, %cst_114 {dimension_numbers = #tpu.dot_dimension_numbers<[1], [0], [0], [1], [0, 0, 1, 1], [], []>} : vector<8x32xf32>, vector<32x32xf32>, vector<8x32xf32> -> vector<8x32xf32>
    %226 = arith.addf %224, %225 : vector<8x32xf32>
    %227 = arith.addf %226, %12 : vector<8x32xf32>
    %cst_115 = arith.constant 0.000000e+00 : f32
    %228 = vector.broadcast %cst_115 : f32 to vector<8x32xf32>
    %229 = arith.maximumf %227, %228 : vector<8x32xf32>
    %cst_116 = arith.constant dense<0.000000e+00> : vector<8x32xf32>
    %230 = tpu.matmul %229, %4, %cst_116 {dimension_numbers = #tpu.dot_dimension_numbers<[1], [0], [0], [1], [0, 0, 1, 1], [], []>} : vector<8x32xf32>, vector<32x32xf32>, vector<8x32xf32> -> vector<8x32xf32>
    %cst_117 = arith.constant dense<0.000000e+00> : vector<8x32xf32>
    %231 = tpu.matmul %197, %5, %cst_117 {dimension_numbers = #tpu.dot_dimension_numbers<[1], [0], [0], [1], [0, 0, 1, 1], [], []>} : vector<8x32xf32>, vector<32x32xf32>, vector<8x32xf32> -> vector<8x32xf32>
    %232 = arith.addf %230, %231 : vector<8x32xf32>
    %233 = arith.addf %232, %15 : vector<8x32xf32>
    %cst_118 = arith.constant 0.000000e+00 : f32
    %234 = vector.broadcast %cst_118 : f32 to vector<8x32xf32>
    %235 = arith.maximumf %233, %234 : vector<8x32xf32>
    %cst_119 = arith.constant dense<0.000000e+00> : vector<8x128xf32>
    %236 = tpu.matmul %235, %6, %cst_119 {dimension_numbers = #tpu.dot_dimension_numbers<[1], [0], [0], [1], [0, 0, 1, 1], [], []>} : vector<8x32xf32>, vector<32x128xf32>, vector<8x128xf32> -> vector<8x128xf32>
    %237 = arith.addf %236, %18 : vector<8x128xf32>
    %cst_120 = arith.constant dense<0xFF800000> : vector<8xf32>
    %238 = vector.multi_reduction <maximumf>, %237, %cst_120 [1] : vector<8x128xf32> to vector<8xf32>
    %239 = vector.shape_cast %238 : vector<8xf32> to vector<8x1xf32>
    %240 = vector.broadcast %239 : vector<8x1xf32> to vector<8x128xf32>
    %241 = arith.subf %237, %240 : vector<8x128xf32>
    %242 = math.exp %241 : vector<8x128xf32>
    %cst_121 = arith.constant dense<0.000000e+00> : vector<8xf32>
    %243 = vector.multi_reduction <add>, %242, %cst_121 [1] : vector<8x128xf32> to vector<8xf32>
    %244 = vector.shape_cast %243 : vector<8xf32> to vector<8x1xf32>
    %245 = math.log %244 : vector<8x1xf32>
    %246 = arith.addf %245, %239 : vector<8x1xf32>
    %247 = vector.broadcast %246 : vector<8x1xf32> to vector<8x128xf32>
    %248 = arith.subf %237, %247 : vector<8x128xf32>
    %249 = arith.index_cast %c5_i32 : i32 to index
    %c0_122 = arith.constant 0 : index
    %c0_123 = arith.constant 0 : index
    %250 = vector.load %arg16[%249, %c0_122, %c0_123] : memref<8x8x128xf32, #tpu.memory_space<vmem>>, vector<1x8x128xf32>
    %251 = vector.shape_cast %250 : vector<1x8x128xf32> to vector<8x128xf32>
    %252 = vector.shape_cast %248 : vector<8x128xf32> to vector<1x8x128xf32>
    tpu.vector_store %arg16[%249, %c0_122, %c0_123], %252 {strides = array<i32>} : memref<8x8x128xf32, #tpu.memory_space<vmem>>, vector<1x8x128xf32>,
    %c6_i32 = arith.constant 6 : i32
    %253 = arith.index_cast %c6_i32 : i32 to index
    %c0_124 = arith.constant 0 : index
    %c0_125 = arith.constant 0 : index
    %254 = vector.load %arg1[%253, %c0_124, %c0_125] : memref<8x8x32xf32, #tpu.memory_space<vmem>>, vector<1x8x32xf32>
    %255 = vector.shape_cast %254 : vector<1x8x32xf32> to vector<8x32xf32>
    %cst_126 = arith.constant dense<0.000000e+00> : vector<8x32xf32>
    %256 = tpu.matmul %255, %0, %cst_126 {dimension_numbers = #tpu.dot_dimension_numbers<[1], [0], [0], [1], [0, 0, 1, 1], [], []>} : vector<8x32xf32>, vector<32x32xf32>, vector<8x32xf32> -> vector<8x32xf32>
    %cst_127 = arith.constant dense<0.000000e+00> : vector<8x32xf32>
    %257 = tpu.matmul %223, %1, %cst_127 {dimension_numbers = #tpu.dot_dimension_numbers<[1], [0], [0], [1], [0, 0, 1, 1], [], []>} : vector<8x32xf32>, vector<32x32xf32>, vector<8x32xf32> -> vector<8x32xf32>
    %258 = arith.addf %256, %257 : vector<8x32xf32>
    %259 = arith.addf %258, %9 : vector<8x32xf32>
    %cst_128 = arith.constant 0.000000e+00 : f32
    %260 = vector.broadcast %cst_128 : f32 to vector<8x32xf32>
    %261 = arith.maximumf %259, %260 : vector<8x32xf32>
    %cst_129 = arith.constant dense<0.000000e+00> : vector<8x32xf32>
    %262 = tpu.matmul %261, %2, %cst_129 {dimension_numbers = #tpu.dot_dimension_numbers<[1], [0], [0], [1], [0, 0, 1, 1], [], []>} : vector<8x32xf32>, vector<32x32xf32>, vector<8x32xf32> -> vector<8x32xf32>
    %cst_130 = arith.constant dense<0.000000e+00> : vector<8x32xf32>
    %263 = tpu.matmul %229, %3, %cst_130 {dimension_numbers = #tpu.dot_dimension_numbers<[1], [0], [0], [1], [0, 0, 1, 1], [], []>} : vector<8x32xf32>, vector<32x32xf32>, vector<8x32xf32> -> vector<8x32xf32>
    %264 = arith.addf %262, %263 : vector<8x32xf32>
    %265 = arith.addf %264, %12 : vector<8x32xf32>
    %cst_131 = arith.constant 0.000000e+00 : f32
    %266 = vector.broadcast %cst_131 : f32 to vector<8x32xf32>
    %267 = arith.maximumf %265, %266 : vector<8x32xf32>
    %cst_132 = arith.constant dense<0.000000e+00> : vector<8x32xf32>
    %268 = tpu.matmul %267, %4, %cst_132 {dimension_numbers = #tpu.dot_dimension_numbers<[1], [0], [0], [1], [0, 0, 1, 1], [], []>} : vector<8x32xf32>, vector<32x32xf32>, vector<8x32xf32> -> vector<8x32xf32>
    %cst_133 = arith.constant dense<0.000000e+00> : vector<8x32xf32>
    %269 = tpu.matmul %235, %5, %cst_133 {dimension_numbers = #tpu.dot_dimension_numbers<[1], [0], [0], [1], [0, 0, 1, 1], [], []>} : vector<8x32xf32>, vector<32x32xf32>, vector<8x32xf32> -> vector<8x32xf32>
    %270 = arith.addf %268, %269 : vector<8x32xf32>
    %271 = arith.addf %270, %15 : vector<8x32xf32>
    %cst_134 = arith.constant 0.000000e+00 : f32
    %272 = vector.broadcast %cst_134 : f32 to vector<8x32xf32>
    %273 = arith.maximumf %271, %272 : vector<8x32xf32>
    %cst_135 = arith.constant dense<0.000000e+00> : vector<8x128xf32>
    %274 = tpu.matmul %273, %6, %cst_135 {dimension_numbers = #tpu.dot_dimension_numbers<[1], [0], [0], [1], [0, 0, 1, 1], [], []>} : vector<8x32xf32>, vector<32x128xf32>, vector<8x128xf32> -> vector<8x128xf32>
    %275 = arith.addf %274, %18 : vector<8x128xf32>
    %cst_136 = arith.constant dense<0xFF800000> : vector<8xf32>
    %276 = vector.multi_reduction <maximumf>, %275, %cst_136 [1] : vector<8x128xf32> to vector<8xf32>
    %277 = vector.shape_cast %276 : vector<8xf32> to vector<8x1xf32>
    %278 = vector.broadcast %277 : vector<8x1xf32> to vector<8x128xf32>
    %279 = arith.subf %275, %278 : vector<8x128xf32>
    %280 = math.exp %279 : vector<8x128xf32>
    %cst_137 = arith.constant dense<0.000000e+00> : vector<8xf32>
    %281 = vector.multi_reduction <add>, %280, %cst_137 [1] : vector<8x128xf32> to vector<8xf32>
    %282 = vector.shape_cast %281 : vector<8xf32> to vector<8x1xf32>
    %283 = math.log %282 : vector<8x1xf32>
    %284 = arith.addf %283, %277 : vector<8x1xf32>
    %285 = vector.broadcast %284 : vector<8x1xf32> to vector<8x128xf32>
    %286 = arith.subf %275, %285 : vector<8x128xf32>
    %287 = arith.index_cast %c6_i32 : i32 to index
    %c0_138 = arith.constant 0 : index
    %c0_139 = arith.constant 0 : index
    %288 = vector.load %arg16[%287, %c0_138, %c0_139] : memref<8x8x128xf32, #tpu.memory_space<vmem>>, vector<1x8x128xf32>
    %289 = vector.shape_cast %288 : vector<1x8x128xf32> to vector<8x128xf32>
    %290 = vector.shape_cast %286 : vector<8x128xf32> to vector<1x8x128xf32>
    tpu.vector_store %arg16[%287, %c0_138, %c0_139], %290 {strides = array<i32>} : memref<8x8x128xf32, #tpu.memory_space<vmem>>, vector<1x8x128xf32>,
    %c7_i32 = arith.constant 7 : i32
    %291 = arith.index_cast %c7_i32 : i32 to index
    %c0_140 = arith.constant 0 : index
    %c0_141 = arith.constant 0 : index
    %292 = vector.load %arg1[%291, %c0_140, %c0_141] : memref<8x8x32xf32, #tpu.memory_space<vmem>>, vector<1x8x32xf32>
    %293 = vector.shape_cast %292 : vector<1x8x32xf32> to vector<8x32xf32>
    %cst_142 = arith.constant dense<0.000000e+00> : vector<8x32xf32>
    %294 = tpu.matmul %293, %0, %cst_142 {dimension_numbers = #tpu.dot_dimension_numbers<[1], [0], [0], [1], [0, 0, 1, 1], [], []>} : vector<8x32xf32>, vector<32x32xf32>, vector<8x32xf32> -> vector<8x32xf32>
    %cst_143 = arith.constant dense<0.000000e+00> : vector<8x32xf32>
    %295 = tpu.matmul %261, %1, %cst_143 {dimension_numbers = #tpu.dot_dimension_numbers<[1], [0], [0], [1], [0, 0, 1, 1], [], []>} : vector<8x32xf32>, vector<32x32xf32>, vector<8x32xf32> -> vector<8x32xf32>
    %296 = arith.addf %294, %295 : vector<8x32xf32>
    %297 = arith.addf %296, %9 : vector<8x32xf32>
    %cst_144 = arith.constant 0.000000e+00 : f32
    %298 = vector.broadcast %cst_144 : f32 to vector<8x32xf32>
    %299 = arith.maximumf %297, %298 : vector<8x32xf32>
    %cst_145 = arith.constant dense<0.000000e+00> : vector<8x32xf32>
    %300 = tpu.matmul %299, %2, %cst_145 {dimension_numbers = #tpu.dot_dimension_numbers<[1], [0], [0], [1], [0, 0, 1, 1], [], []>} : vector<8x32xf32>, vector<32x32xf32>, vector<8x32xf32> -> vector<8x32xf32>
    %cst_146 = arith.constant dense<0.000000e+00> : vector<8x32xf32>
    %301 = tpu.matmul %267, %3, %cst_146 {dimension_numbers = #tpu.dot_dimension_numbers<[1], [0], [0], [1], [0, 0, 1, 1], [], []>} : vector<8x32xf32>, vector<32x32xf32>, vector<8x32xf32> -> vector<8x32xf32>
    %302 = arith.addf %300, %301 : vector<8x32xf32>
    %303 = arith.addf %302, %12 : vector<8x32xf32>
    %cst_147 = arith.constant 0.000000e+00 : f32
    %304 = vector.broadcast %cst_147 : f32 to vector<8x32xf32>
    %305 = arith.maximumf %303, %304 : vector<8x32xf32>
    %cst_148 = arith.constant dense<0.000000e+00> : vector<8x32xf32>
    %306 = tpu.matmul %305, %4, %cst_148 {dimension_numbers = #tpu.dot_dimension_numbers<[1], [0], [0], [1], [0, 0, 1, 1], [], []>} : vector<8x32xf32>, vector<32x32xf32>, vector<8x32xf32> -> vector<8x32xf32>
    %cst_149 = arith.constant dense<0.000000e+00> : vector<8x32xf32>
    %307 = tpu.matmul %273, %5, %cst_149 {dimension_numbers = #tpu.dot_dimension_numbers<[1], [0], [0], [1], [0, 0, 1, 1], [], []>} : vector<8x32xf32>, vector<32x32xf32>, vector<8x32xf32> -> vector<8x32xf32>
    %308 = arith.addf %306, %307 : vector<8x32xf32>
    %309 = arith.addf %308, %15 : vector<8x32xf32>
    %cst_150 = arith.constant 0.000000e+00 : f32
    %310 = vector.broadcast %cst_150 : f32 to vector<8x32xf32>
    %311 = arith.maximumf %309, %310 : vector<8x32xf32>
    %cst_151 = arith.constant dense<0.000000e+00> : vector<8x128xf32>
    %312 = tpu.matmul %311, %6, %cst_151 {dimension_numbers = #tpu.dot_dimension_numbers<[1], [0], [0], [1], [0, 0, 1, 1], [], []>} : vector<8x32xf32>, vector<32x128xf32>, vector<8x128xf32> -> vector<8x128xf32>
    %313 = arith.addf %312, %18 : vector<8x128xf32>
    %cst_152 = arith.constant dense<0xFF800000> : vector<8xf32>
    %314 = vector.multi_reduction <maximumf>, %313, %cst_152 [1] : vector<8x128xf32> to vector<8xf32>
    %315 = vector.shape_cast %314 : vector<8xf32> to vector<8x1xf32>
    %316 = vector.broadcast %315 : vector<8x1xf32> to vector<8x128xf32>
    %317 = arith.subf %313, %316 : vector<8x128xf32>
    %318 = math.exp %317 : vector<8x128xf32>
    %cst_153 = arith.constant dense<0.000000e+00> : vector<8xf32>
    %319 = vector.multi_reduction <add>, %318, %cst_153 [1] : vector<8x128xf32> to vector<8xf32>
    %320 = vector.shape_cast %319 : vector<8xf32> to vector<8x1xf32>
    %321 = math.log %320 : vector<8x1xf32>
    %322 = arith.addf %321, %315 : vector<8x1xf32>
    %323 = vector.broadcast %322 : vector<8x1xf32> to vector<8x128xf32>
    %324 = arith.subf %313, %323 : vector<8x128xf32>
    %325 = arith.index_cast %c7_i32 : i32 to index
    %c0_154 = arith.constant 0 : index
    %c0_155 = arith.constant 0 : index
    %326 = vector.load %arg16[%325, %c0_154, %c0_155] : memref<8x8x128xf32, #tpu.memory_space<vmem>>, vector<1x8x128xf32>
    %327 = vector.shape_cast %326 : vector<1x8x128xf32> to vector<8x128xf32>
    %328 = vector.shape_cast %324 : vector<8x128xf32> to vector<1x8x128xf32>
    tpu.vector_store %arg16[%325, %c0_154, %c0_155], %328 {strides = array<i32>} : memref<8x8x128xf32, #tpu.memory_space<vmem>>, vector<1x8x128xf32>,
    %c8_i32 = arith.constant 8 : i32
    %c0_156 = arith.constant 0 : index
    %c0_157 = arith.constant 0 : index
    %329 = vector.load %arg17[%c0_156, %c0_157] : memref<8x32xf32, #tpu.memory_space<vmem>>, vector<8x32xf32>
    tpu.vector_store %arg17[%c0_156, %c0_157], %299 {strides = array<i32>} : memref<8x32xf32, #tpu.memory_space<vmem>>, vector<8x32xf32>,
    %c0_158 = arith.constant 0 : index
    %c0_159 = arith.constant 0 : index
    %330 = vector.load %arg18[%c0_158, %c0_159] : memref<8x32xf32, #tpu.memory_space<vmem>>, vector<8x32xf32>
    tpu.vector_store %arg18[%c0_158, %c0_159], %305 {strides = array<i32>} : memref<8x32xf32, #tpu.memory_space<vmem>>, vector<8x32xf32>,
    %c0_160 = arith.constant 0 : index
    %c0_161 = arith.constant 0 : index
    %331 = vector.load %arg19[%c0_160, %c0_161] : memref<8x32xf32, #tpu.memory_space<vmem>>, vector<8x32xf32>
    tpu.vector_store %arg19[%c0_160, %c0_161], %311 {strides = array<i32>} : memref<8x32xf32, #tpu.memory_space<vmem>>, vector<8x32xf32>,
    return
  }
  func.func @transform_0(%arg0: i32) -> (i32, i32, i32) {
    %c0_i32 = arith.constant 0 : i32
    %c0_i32_0 = arith.constant 0 : i32
    %c0_i32_1 = arith.constant 0 : i32
    return %arg0, %c0_i32, %c0_i32_0 : i32, i32, i32
  }
  func.func @transform_1(%arg0: i32) -> (i32, i32) {
    %c0_i32 = arith.constant 0 : i32
    %c0_i32_0 = arith.constant 0 : i32
    %c0_i32_1 = arith.constant 0 : i32
    return %c0_i32, %c0_i32_0 : i32, i32
  }
  func.func @transform_2(%arg0: i32) -> (i32, i32) {
    %c0_i32 = arith.constant 0 : i32
    %c0_i32_0 = arith.constant 0 : i32
    %c0_i32_1 = arith.constant 0 : i32
    return %c0_i32, %c0_i32_0 : i32, i32
  }
  func.func @transform_3(%arg0: i32) -> (i32, i32) {
    %c0_i32 = arith.constant 0 : i32
    %c0_i32_0 = arith.constant 0 : i32
    %c0_i32_1 = arith.constant 0 : i32
    return %c0_i32, %c0_i32_0 : i32, i32
  }
  func.func @transform_4(%arg0: i32) -> (i32, i32) {
    %c0_i32 = arith.constant 0 : i32
    %c0_i32_0 = arith.constant 0 : i32
    %c0_i32_1 = arith.constant 0 : i32
    return %c0_i32, %c0_i32_0 : i32, i32
  }
  func.func @transform_5(%arg0: i32) -> (i32, i32) {
    %c0_i32 = arith.constant 0 : i32
    %c0_i32_0 = arith.constant 0 : i32
    %c0_i32_1 = arith.constant 0 : i32
    return %c0_i32, %c0_i32_0 : i32, i32
  }
  func.func @transform_6(%arg0: i32) -> (i32, i32) {
    %c0_i32 = arith.constant 0 : i32
    %c0_i32_0 = arith.constant 0 : i32
    %c0_i32_1 = arith.constant 0 : i32
    return %c0_i32, %c0_i32_0 : i32, i32
  }
  func.func @transform_7(%arg0: i32) -> (i32, i32) {
    %c0_i32 = arith.constant 0 : i32
    %c0_i32_0 = arith.constant 0 : i32
    %c0_i32_1 = arith.constant 0 : i32
    return %c0_i32, %c0_i32_0 : i32, i32
  }
  func.func @transform_8(%arg0: i32) -> (i32, i32) {
    %c0_i32 = arith.constant 0 : i32
    %c0_i32_0 = arith.constant 0 : i32
    %c0_i32_1 = arith.constant 0 : i32
    return %c0_i32, %c0_i32_0 : i32, i32
  }
  func.func @transform_9(%arg0: i32) -> (i32, i32) {
    %c0_i32 = arith.constant 0 : i32
    %c0_i32_0 = arith.constant 0 : i32
    %c0_i32_1 = arith.constant 0 : i32
    return %c0_i32, %c0_i32_0 : i32, i32
  }
  func.func @transform_10(%arg0: i32) -> (i32, i32) {
    %c0_i32 = arith.constant 0 : i32
    %c0_i32_0 = arith.constant 0 : i32
    %c0_i32_1 = arith.constant 0 : i32
    return %c0_i32, %c0_i32_0 : i32, i32
  }
  func.func @transform_11(%arg0: i32) -> (i32, i32) {
    %c0_i32 = arith.constant 0 : i32
    %c0_i32_0 = arith.constant 0 : i32
    %c0_i32_1 = arith.constant 0 : i32
    return %c0_i32, %c0_i32_0 : i32, i32
  }
  func.func @transform_12(%arg0: i32) -> (i32, i32) {
    %c0_i32 = arith.constant 0 : i32
    %c0_i32_0 = arith.constant 0 : i32
    %c0_i32_1 = arith.constant 0 : i32
    return %c0_i32, %c0_i32_0 : i32, i32
  }
  func.func @transform_13(%arg0: i32) -> (i32, i32) {
    %c0_i32 = arith.constant 0 : i32
    %c0_i32_0 = arith.constant 0 : i32
    %c0_i32_1 = arith.constant 0 : i32
    return %c0_i32, %c0_i32_0 : i32, i32
  }
  func.func @transform_14(%arg0: i32) -> (i32, i32) {
    %c0_i32 = arith.constant 0 : i32
    %c0_i32_0 = arith.constant 0 : i32
    %c0_i32_1 = arith.constant 0 : i32
    return %c0_i32, %c0_i32_0 : i32, i32
  }
  func.func @transform_15(%arg0: i32) -> (i32, i32, i32) {
    %c0_i32 = arith.constant 0 : i32
    %c0_i32_0 = arith.constant 0 : i32
    %c0_i32_1 = arith.constant 0 : i32
    return %arg0, %c0_i32, %c0_i32_0 : i32, i32, i32
  }
  func.func @transform_16(%arg0: i32) -> (i32, i32) {
    %c0_i32 = arith.constant 0 : i32
    %c0_i32_0 = arith.constant 0 : i32
    %c0_i32_1 = arith.constant 0 : i32
    return %c0_i32, %c0_i32_0 : i32, i32
  }
  func.func @transform_17(%arg0: i32) -> (i32, i32) {
    %c0_i32 = arith.constant 0 : i32
    %c0_i32_0 = arith.constant 0 : i32
    %c0_i32_1 = arith.constant 0 : i32
    return %c0_i32, %c0_i32_0 : i32, i32
  }
  func.func @transform_18(%arg0: i32) -> (i32, i32) {
    %c0_i32 = arith.constant 0 : i32
    %c0_i32_0 = arith.constant 0 : i32
    %c0_i32_1 = arith.constant 0 : i32
    return %c0_i32, %c0_i32_0 : i32, i32
  }
}

</mosaic_0001>

<bundles_post_ra>
// kernel: tpu_custom_call.1
= control target key start
LH: loop header
LB: loop body
LE: loop exit
PB: predicated region body
PF: predicated region fallthrough
CT: control target
= control target key end

     0   :  { %s7064_s0 = inlined_call_operand.hbm [shape: f32[8,8,32], index: 0, kind: input, shape index: {}]   ;;  %s7065_s1 = inlined_call_operand.hbm [shape: f32[8,32], index: 1, kind: input, shape index: {}]   ;;  %s7066_s2 = inlined_call_operand.hbm [shape: f32[8,32], index: 2, kind: input, shape index: {}]   ;;  %s7067_s3 = inlined_call_operand.hbm [shape: f32[8,32], index: 3, kind: input, shape index: {}]   ;;  %s7068_s4 = inlined_call_operand.hbm [shape: f32[32,32], index: 4, kind: input, shape index: {}]   ;;  %s7069_s5 = inlined_call_operand.hbm [shape: f32[32,32], index: 5, kind: input, shape index: {}]   ;;  %s7070_s6 = inlined_call_operand.vmem [shape: f32[1,32], index: 6, kind: input, shape index: {}]   ;;  %s7071_s7 = inlined_call_operand.hbm [shape: f32[32,32], index: 7, kind: input, shape index: {}]   ;;  %s7072_s8 = inlined_call_operand.hbm [shape: f32[32,32], index: 8, kind: input, shape index: {}]   ;;  %s7073_s9 = inlined_call_operand.vmem [shape: f32[1,32], index: 9, kind: input, shape index: {}]   ;;  %s7074_s10 = inlined_call_operand.vmem [shape: f32[32,32], index: 10, kind: input, shape index: {}]   ;;  %s7075_s11 = inlined_call_operand.hbm [shape: f32[32,32], index: 11, kind: input, shape index: {}]   ;;  %s7076_s12 = inlined_call_operand.vmem [shape: f32[1,32], index: 12, kind: input, shape index: {}]   ;;  %s7077_s13 = inlined_call_operand.hbm [shape: f32[32,128], index: 13, kind: input, shape index: {}]   ;;  %s7078_s14 = inlined_call_operand.vmem [shape: f32[1,128], index: 14, kind: input, shape index: {}]   ;;  %s7079_s15 = inlined_call_operand.hbm [shape: f32[8,8,128], index: 15, kind: output, shape index: {0}]   ;;  %s7080_s16 = inlined_call_operand.hbm [shape: f32[8,32], index: 16, kind: output, shape index: {1}]   ;;  %s7081_s17 = inlined_call_operand.hbm [shape: f32[8,32], index: 17, kind: output, shape index: {2}]   ;;  %s7082_s18 = inlined_call_operand.hbm [shape: f32[8,32], index: 18, kind: output, shape index: {3}]  }
   0x1   :  { %7086 = sst [smem:[#allocation34_spill]] %s7064_s0 }
   0x2   :  { %7087 = sst [smem:[#allocation35_spill]] %s7065_s1 }
   0x3   :  { %7088 = sst [smem:[#allocation36_spill]] %s7066_s2 }
   0x4   :  { %24 = vsyncpa [#allocation3], 0 }
   0x5   :  { %25 = vsyncpa [#allocation6], 0 }
   0x6   :  { %26 = vsyncpa [#allocation9], 0 }
   0x7   :  { %27 = vsyncpa [#allocation12], 0 }
   0x8   :  { %28 = vsyncpa [#allocation15], 0 }
   0x9   :  { %29 = vsyncpa [#allocation18], 0 }
   0xa   :  { %30 = vsyncpa [#allocation4], 0 }
   0xb   :  { %31 = vsyncpa [#allocation21], 0 }
   0xc   :  { %32 = vsyncpa [#allocation24], 0  ;;  %s6187_s27 = smov [#allocation5]   ;;  %s6188_s29 = smov [#allocation8]  }
   0xd   :  { %s51_s28 = sshll.u32 %s6187_s27, 4  ;;  %s71_s30 = sshll.u32 %s6188_s29, 4  ;;  %s52_s28 = int_to_ptr.vmem [resolvable:$true] %s51_s28  ;;  %s72_s30 = int_to_ptr.vmem [resolvable:$true] %s71_s30 }
   0xe   :  { %s7089_s1 = sld [smem:[#allocation35_spill]] }
  0x14   :  { %s5861_s20 = scalar_lea.hbm %s7089_s1, 128 }
  0x15   :  { %p5862_p0 = scmp.ne.s32.totalorder %s7089_s1, %s5861_s20  ;;  %p5865_p1 = scmp.lt.u32.totalorder %s5861_s20, %s7089_s1 }
  0x17   :  { %p5867_p2 = pnand %p5865_p1, %p5862_p0 }
  0x19   :  { %5870 = shalt.err (!%p5867_p2)
}
  0x1a   :  { %s5871_s24 = scalar_lea.vmem %s52_s28, 128  ;;  %p5876_p4 = scmp.lt.s32.totalorder %s52_s28, %s52_s28 }
  0x1b   :  { %p5872_p3 = scmp.ne.s32.totalorder %s52_s28, %s5871_s24  ;;  %p5877_p5 = scmp.lt.s32.totalorder %s5871_s24, %s5871_s24 }
  0x1d   :  { %p5878_p6 = por %p5877_p5, %p5876_p4 }
  0x1f   :  { %p5879_p7 = pnand %p5878_p6, %p5872_p3 }
  0x21   :  { %5882 = shalt.err (!%p5879_p7)
}
  0x22   :  { %54 = dma.hbm_to_vmem [thread:$0]  %s7089_s1, 128, %s52_s28, [#allocation6]  }
  0x23   :  { %s5883_s0 = scalar_lea.hbm %s7067_s3, 128 }
  0x24   :  { %p5884_p8 = scmp.ne.s32.totalorder %s7067_s3, %s5883_s0  ;;  %p5887_p9 = scmp.lt.u32.totalorder %s5883_s0, %s7067_s3 }
  0x26   :  { %p5889_p10 = pnand %p5887_p9, %p5884_p8 }
  0x28   :  { %5892 = shalt.err (!%p5889_p10)
}
  0x29   :  { %s5893_s2 = scalar_lea.vmem %s72_s30, 128  ;;  %p5898_p12 = scmp.lt.s32.totalorder %s72_s30, %s72_s30 }
  0x2a   :  { %p5894_p11 = scmp.ne.s32.totalorder %s72_s30, %s5893_s2  ;;  %p5899_p13 = scmp.lt.s32.totalorder %s5893_s2, %s5893_s2 }
  0x2c   :  { %p5900_p0 = por %p5899_p13, %p5898_p12 }
  0x2e   :  { %p5901_p1 = pnand %p5900_p0, %p5894_p11 }
  0x30   :  { %5904 = shalt.err (!%p5901_p1)
}
  0x31   :  { %74 = dma.hbm_to_vmem [thread:$0]  %s7067_s3, 128, %s72_s30, [#allocation9]  }
  0x32   :  { %s6189_s23 = smov [#allocation11]   ;;  %s6190_s25 = smov [#allocation14]  }
  0x33   :  { %s92_s24 = sshll.u32 %s6189_s23, 4  ;;  %s118_s26 = sshll.u32 %s6190_s25, 4  ;;  %s93_s24 = int_to_ptr.vmem [resolvable:$true] %s92_s24  ;;  %s6325_s26 = int_to_ptr.vmem [resolvable:$true] %s118_s26 }
  0x34   :  { %s5905_s0 = scalar_lea.hbm %s7069_s5, 512 }
  0x35   :  { %p5906_p2 = scmp.ne.s32.totalorder %s7069_s5, %s5905_s0  ;;  %p5909_p3 = scmp.lt.u32.totalorder %s5905_s0, %s7069_s5 }
  0x37   :  { %p5911_p4 = pnand %p5909_p3, %p5906_p2 }
  0x39   :  { %5914 = shalt.err (!%p5911_p4)
}
  0x3a   :  { %s5915_s3 = scalar_lea.vmem %s93_s24, 512  ;;  %p5920_p6 = scmp.lt.s32.totalorder %s93_s24, %s93_s24 }
  0x3b   :  { %p5916_p5 = scmp.ne.s32.totalorder %s93_s24, %s5915_s3  ;;  %p5921_p7 = scmp.lt.s32.totalorder %s5915_s3, %s5915_s3 }
  0x3d   :  { %p5922_p8 = por %p5921_p7, %p5920_p6 }
  0x3f   :  { %p5923_p9 = pnand %p5922_p8, %p5916_p5 }
  0x41   :  { %5926 = shalt.err (!%p5923_p9)
}
  0x42   :  { %s6191_s30 = smov 128   ;;  %s6192_s2 = smov 8  }
  0x43   :  { %98 = dma.hbm_to_vmem [thread:$0]  %s7069_s5, 512, %s93_s24, [#allocation12], %s6191_s30, %s6191_s30, %s6192_s2  }
  0x44   :  { %s5927_s27 = scalar_lea.hbm %s7072_s8, 512 }
  0x45   :  { %p5928_p10 = scmp.ne.s32.totalorder %s7072_s8, %s5927_s27  ;;  %p5931_p11 = scmp.lt.u32.totalorder %s5927_s27, %s7072_s8 }
  0x47   :  { %p5933_p12 = pnand %p5931_p11, %p5928_p10 }
  0x49   :  { %5936 = shalt.err (!%p5933_p12)
}
  0x4a   :  { %s5937_s20 = scalar_lea.vmem %s6325_s26, 512  ;;  %p5942_p0 = scmp.lt.s32.totalorder %s6325_s26, %s6325_s26 }
  0x4b   :  { %p5938_p13 = scmp.ne.s32.totalorder %s6325_s26, %s5937_s20  ;;  %p5943_p1 = scmp.lt.s32.totalorder %s5937_s20, %s5937_s20 }
  0x4d   :  { %p5944_p2 = por %p5943_p1, %p5942_p0 }
  0x4f   :  { %p5945_p3 = pnand %p5944_p2, %p5938_p13 }
  0x51   :  { %5948 = shalt.err (!%p5945_p3)
}
  0x52   :  { %124 = dma.hbm_to_vmem [thread:$0]  %s7072_s8, 512, %s6325_s26, [#allocation15], %s6191_s30, %s6191_s30, %s6192_s2  }
  0x53   :  { %s6193_s22 = smov [#allocation2]   ;;  %s6194_s28 = smov [#allocation7]  }
  0x54   :  { %s38_s3 = sshll.u32 %s6193_s22, 4  ;;  %s61_s1 = sshll.u32 %s6194_s28, 4  ;;  %s39_s3 = int_to_ptr.vmem [resolvable:$true] %s38_s3  ;;  %s62_s1 = int_to_ptr.vmem [resolvable:$true] %s61_s1 }
  0x55   :  { %s7090_s27 = sld [smem:[#allocation34_spill]] }
  0x5b   :  { %s5949_s29 = scalar_lea.hbm %s7090_s27, 1024 }
  0x5c   :  { %p5950_p4 = scmp.ne.s32.totalorder %s7090_s27, %s5949_s29  ;;  %p5953_p5 = scmp.lt.u32.totalorder %s5949_s29, %s7090_s27 }
  0x5e   :  { %p5955_p6 = pnand %p5953_p5, %p5950_p4 }
  0x60   :  { %5958 = shalt.err (!%p5955_p6)
}
  0x61   :  { %s5959_s8 = scalar_lea.vmem %s39_s3, 1024  ;;  %p5964_p8 = scmp.lt.s32.totalorder %s39_s3, %s39_s3 }
  0x62   :  { %p5960_p7 = scmp.ne.s32.totalorder %s39_s3, %s5959_s8  ;;  %p5965_p9 = scmp.lt.s32.totalorder %s5959_s8, %s5959_s8 }
  0x64   :  { %p5966_p10 = por %p5965_p9, %p5964_p8 }
  0x66   :  { %p5967_p11 = pnand %p5966_p10, %p5960_p7 }
  0x68   :  { %5970 = shalt.err (!%p5967_p11)
}
  0x69   :  { %44 = dma.hbm_to_vmem [thread:$0]  %s7090_s27, 1024, %s39_s3, [#allocation3], %s6191_s30, %s6191_s30, %s6192_s2  }
  0x6a   :  { %s7091_s28 = sld [smem:[#allocation36_spill]] }
  0x70   :  { %s5971_s23 = scalar_lea.hbm %s7091_s28, 128 }
  0x71   :  { %p5972_p12 = scmp.ne.s32.totalorder %s7091_s28, %s5971_s23  ;;  %p5975_p13 = scmp.lt.u32.totalorder %s5971_s23, %s7091_s28 }
  0x73   :  { %p5977_p0 = pnand %p5975_p13, %p5972_p12 }
  0x75   :  { %5980 = shalt.err (!%p5977_p0)
}
  0x76   :  { %s5981_s21 = scalar_lea.vmem %s62_s1, 128  ;;  %p5986_p2 = scmp.lt.s32.totalorder %s62_s1, %s62_s1 }
  0x77   :  { %p5982_p1 = scmp.ne.s32.totalorder %s62_s1, %s5981_s21  ;;  %p5987_p3 = scmp.lt.s32.totalorder %s5981_s21, %s5981_s21 }
  0x79   :  { %p5988_p4 = por %p5987_p3, %p5986_p2 }
  0x7b   :  { %p5989_p5 = pnand %p5988_p4, %p5982_p1 }
  0x7d   :  { %5992 = shalt.err (!%p5989_p5)
}
  0x7e   :  { %64 = dma.hbm_to_vmem [thread:$0]  %s7091_s28, 128, %s62_s1, [#allocation6]  }
  0x7f   :  { %s6195_s20 = smov [#allocation10]   ;;  %s6196_s26 = smov [#allocation13]  }
  0x80   :  { %s80_s8 = sshll.u32 %s6195_s20, 4  ;;  %s106_s5 = sshll.u32 %s6196_s26, 4  ;;  %s81_s8 = int_to_ptr.vmem [resolvable:$true] %s80_s8  ;;  %s6389_s5 = int_to_ptr.vmem [resolvable:$true] %s106_s5 }
  0x81   :  { %s5993_s23 = scalar_lea.hbm %s7068_s4, 512 }
  0x82   :  { %p5994_p6 = scmp.ne.s32.totalorder %s7068_s4, %s5993_s23  ;;  %p5997_p7 = scmp.lt.u32.totalorder %s5993_s23, %s7068_s4 }
  0x84   :  { %p5999_p8 = pnand %p5997_p7, %p5994_p6 }
  0x86   :  { %6002 = shalt.err (!%p5999_p8)
}
  0x87   :  { %s6003_s1 = scalar_lea.vmem %s81_s8, 512  ;;  %p6008_p10 = scmp.lt.s32.totalorder %s81_s8, %s81_s8 }
  0x88   :  { %p6004_p9 = scmp.ne.s32.totalorder %s81_s8, %s6003_s1  ;;  %p6009_p11 = scmp.lt.s32.totalorder %s6003_s1, %s6003_s1 }
  0x8a   :  { %p6010_p12 = por %p6009_p11, %p6008_p10 }
  0x8c   :  { %p6011_p13 = pnand %p6010_p12, %p6004_p9 }
  0x8e   :  { %6014 = shalt.err (!%p6011_p13)
}
  0x8f   :  { %86 = dma.hbm_to_vmem [thread:$0]  %s7068_s4, 512, %s81_s8, [#allocation9], %s6191_s30, %s6191_s30, %s6192_s2  }
  0x90   :  { %s6015_s20 = scalar_lea.hbm %s7071_s7, 512 }
  0x91   :  { %p6016_p0 = scmp.ne.s32.totalorder %s7071_s7, %s6015_s20  ;;  %p6019_p1 = scmp.lt.u32.totalorder %s6015_s20, %s7071_s7 }
  0x93   :  { %p6021_p2 = pnand %p6019_p1, %p6016_p0 }
  0x95   :  { %6024 = shalt.err (!%p6021_p2)
}
  0x96   :  { %s6025_s25 = scalar_lea.vmem %s6389_s5, 512  ;;  %p6030_p4 = scmp.lt.s32.totalorder %s6389_s5, %s6389_s5 }
  0x97   :  { %p6026_p3 = scmp.ne.s32.totalorder %s6389_s5, %s6025_s25  ;;  %p6031_p5 = scmp.lt.s32.totalorder %s6025_s25, %s6025_s25 }
  0x99   :  { %p6032_p6 = por %p6031_p5, %p6030_p4 }
  0x9b   :  { %p6033_p7 = pnand %p6032_p6, %p6026_p3 }
  0x9d   :  { %6036 = shalt.err (!%p6033_p7)
}
  0x9e   :  { %112 = dma.hbm_to_vmem [thread:$0]  %s7071_s7, 512, %s6389_s5, [#allocation12], %s6191_s30, %s6191_s30, %s6192_s2  }
  0x9f   :  { %s6197_s29 = smov [#allocation16]   ;;  %s6198_s19 = smov [#allocation17]  }
  0xa0   :  { %s134_s0 = sshll.u32 %s6197_s29, 4  ;;  %s148_s1 = sshll.u32 %s6198_s19, 4  ;;  %s135_s0 = int_to_ptr.vmem [resolvable:$true] %s134_s0  ;;  %s6426_s1 = int_to_ptr.vmem [resolvable:$true] %s148_s1 }
  0xa1   :  { %s6037_s3 = scalar_lea.hbm %s7075_s11, 512 }
  0xa2   :  { %p6038_p8 = scmp.ne.s32.totalorder %s7075_s11, %s6037_s3  ;;  %p6041_p9 = scmp.lt.u32.totalorder %s6037_s3, %s7075_s11 }
  0xa4   :  { %p6043_p10 = pnand %p6041_p9, %p6038_p8 }
  0xa6   :  { %6046 = shalt.err (!%p6043_p10)
}
  0xa7   :  { %s6047_s7 = scalar_lea.vmem %s135_s0, 512  ;;  %p6052_p12 = scmp.lt.s32.totalorder %s135_s0, %s135_s0 }
  0xa8   :  { %p6048_p11 = scmp.ne.s32.totalorder %s135_s0, %s6047_s7  ;;  %p6053_p13 = scmp.lt.s32.totalorder %s6047_s7, %s6047_s7 }
  0xaa   :  { %p6054_p0 = por %p6053_p13, %p6052_p12 }
  0xac   :  { %p6055_p1 = pnand %p6054_p0, %p6048_p11 }
  0xae   :  { %6058 = shalt.err (!%p6055_p1)
}
  0xaf   :  { %140 = dma.hbm_to_vmem [thread:$0]  %s7075_s11, 512, %s135_s0, [#allocation15], %s6191_s30, %s6191_s30, %s6192_s2  }
  0xb0   :  { %s6059_s4 = scalar_lea.hbm %s7077_s13, 512 }
  0xb1   :  { %p6060_p2 = scmp.ne.s32.totalorder %s7077_s13, %s6059_s4  ;;  %p6063_p3 = scmp.lt.u32.totalorder %s6059_s4, %s7077_s13 }
  0xb3   :  { %p6065_p4 = pnand %p6063_p3, %p6060_p2 }
  0xb5   :  { %6068 = shalt.err (!%p6065_p4)
}
  0xb6   :  { %s6069_s21 = scalar_lea.vmem %s6426_s1, 512  ;;  %p6074_p6 = scmp.lt.s32.totalorder %s6426_s1, %s6426_s1 }
  0xb7   :  { %p6070_p5 = scmp.ne.s32.totalorder %s6426_s1, %s6069_s21  ;;  %p6075_p7 = scmp.lt.s32.totalorder %s6069_s21, %s6069_s21 }
  0xb9   :  { %p6076_p8 = por %p6075_p7, %p6074_p6 }
  0xbb   :  { %p6077_p9 = pnand %p6076_p8, %p6070_p5 }
  0xbd   :  { %6080 = shalt.err (!%p6077_p9)
}
  0xbe   :  { %154 = dma.hbm_to_vmem [thread:$0]  %s7077_s13, 512, %s6426_s1, [#allocation18], %s6191_s30, %s6191_s30, %s6192_s2  }
  0xbf   :  { %6169 = dma.done.wait [#allocation3], 1024  }
  0xc0   :  { %6170 = vsyncadd [#allocation3], 4294966272 }
  0xc1   :  { %6171 = dma.done.wait [#allocation6], 256  }
  0xc2   :  { %6172 = vsyncadd [#allocation6], 4294967040 }
  0xc3   :  { %6173 = dma.done.wait [#allocation9], 640  }
  0xc4   :  { %6174 = vsyncadd [#allocation9], 4294966656 }
  0xc5   :  { %6175 = dma.done.wait [#allocation12], 1024  }
  0xc6   :  { %6176 = vsyncadd [#allocation12], 4294966272 }
  0xc7   :  { %6177 = dma.done.wait [#allocation15], 1024  }
  0xc8   :  { %6178 = vsyncadd [#allocation15], 4294966272 }
  0xc9   :  { %6179 = dma.done.wait [#allocation18], 512  }
  0xca   :  { %6180 = vsyncadd [#allocation18], 4294966784  ;;  %v6199_v0 = vmov 0.0|0.0   ;;  %vm6200_vm0 = vmmov 0   ;;  %v6201_v1 = vmov 0.0   ;;  %v191_v2 = vld [vmem:[#allocation11] sm:$0xff] }
  0xcb   :  { %5471 = vmatprep.subr.bf16.mxu0 %v6199_v0  ;;  %5477 = vmatprep.subr.bf16.mxu1 %v6199_v0  ;;  %v192_v3 = vld [vmem:[#allocation11 + $0x8] sm:$0xff]  ;;  %v187_v4 = vld [vmem:[#allocation10] sm:$0xff]  ;;  %vm248_vm1 = vcmask 261120   ;;  %v193_v7 = vld [vmem:[#allocation11 + $0x10] sm:$0xff] }
  0xcc   :  { %4863 = vmatprep.mubr.msk.f32.mxu0 %vm6200_vm0, %v6201_v1  ;;  %4874 = vmatprep.mubr.msk.f32.mxu1 %vm6200_vm0, %v6201_v1  ;;  %v6469_v5 = vpack.c.bf16 %v192_v3, %v191_v2  ;;  %v188_v6 = vld [vmem:[#allocation10 + $0x8] sm:$0xff]  ;;  %v194_v8 = vld [vmem:[#allocation11 + $0x18] sm:$0xff]  ;;  %v189_v10 = vld [vmem:[#allocation10 + $0x10] sm:$0xff] }
  0xcd   :  { %v6471_v9 = vpack.c.bf16 %v188_v6, %v187_v4  ;;  %v190_v11 = vld [vmem:[#allocation10 + $0x18] sm:$0xff]  ;;  %v247_v12 = vld [vmem:[#allocation5] sm:$0xff]  ;;  %v6474_v13 = vpack.c.bf16 %v194_v8, %v193_v7  ;;  %v199_v15 = vld [vmem:[#allocation14] sm:$0xff] }
  0xce   :  { %5473 = vmatpush3.bf16.msra.mxu0 %v6469_v5  ;;  %249 = vst.msk [vmem:[#allocation20] sm:$0xff] %vm248_vm1, %v247_v12  ;;  %v6479_v14 = vpack.c.bf16 %v190_v11, %v189_v10  ;;  %v200_v16 = vld [vmem:[#allocation14 + $0x8] sm:$0xff]  ;;  %v195_v20 = vld [vmem:[#allocation13] sm:$0xff]  ;;  %v250_v22 = vld [vmem:[#allocation7] sm:$0xff] }
  0xcf   :  { %5479 = vmatpush3.bf16.msra.mxu1 %v6471_v9  ;;  %5474 = vmatprep.subr.bf16.mxu0 %v6199_v0  ;;  %v257_v17 = vld [vmem:[#allocation2] sm:$0xff]  ;;  %v6485_v18 = vpack.c.bf16 %v200_v16, %v199_v15  ;;  %251 = vst.msk [vmem:[#allocation22] sm:$0xff] %vm248_vm1, %v250_v22  ;;  %v201_v24 = vld [vmem:[#allocation14 + $0x10] sm:$0xff]  ;;  %v202_v25 = vld [vmem:[#allocation14 + $0x18] sm:$0xff] }
  0xd0   :  { %5480 = vmatprep.subr.bf16.mxu1 %v6199_v0  ;;  %v196_v21 = vld [vmem:[#allocation13 + $0x8] sm:$0xff]  ;;  %v6500_v26 = vpack.c.bf16 %v202_v25, %v201_v24  ;;  %v197_v27 = vld [vmem:[#allocation13 + $0x10] sm:$0xff]  ;;  %v198_v28 = vld [vmem:[#allocation13 + $0x18] sm:$0xff] }
  0xd1   :  { %v6496_v23 = vpack.c.bf16 %v196_v21, %v195_v20  ;;  %v6503_v29 = vpack.c.bf16 %v198_v28, %v197_v27  ;;  %v207_v31 = vld [vmem:[#allocation16] sm:$0xff]  ;;  %v208_v32 = vld [vmem:[#allocation16 + $0x8] sm:$0xff]  ;;  %v204_v41 = vld [vmem:[%s7074_s10 + $0x8] sm:$0xff] }
  0xd2   :  { %5476 = vmatpush3.bf16.msra.mxu0 %v6474_v13  ;;  %v6512_v33 = vpack.c.bf16 %v208_v32, %v207_v31  ;;  %v6519_v35 = vld [vmem:[%s7070_s6] ss:$0 sm:$0xff]  ;;  %v252_v45 = vld [vmem:[#allocation8] sm:$0xff]  ;;  %v209_v48 = vld [vmem:[#allocation16 + $0x10] sm:$0xff] }
  0xd3   :  { %5482 = vmatpush3.bf16.msra.mxu1 %v6479_v14  ;;  %5483 = vmatprep.subr.bf16.mxu0 %v6199_v0  ;;  %v203_v40 = vld [vmem:[%s7074_s10] sm:$0xff]  ;;  %253 = vst.msk [vmem:[#allocation23] sm:$0xff] %vm248_vm1, %v252_v45  ;;  %v210_v49 = vld [vmem:[#allocation16 + $0x18] sm:$0xff]  ;;  %v206_v52 = vld [vmem:[%s7074_s10 + $0x18] sm:$0xff] }
  0xd4   :  { %5489 = vmatprep.subr.bf16.mxu1 %v6199_v0  ;;  %v6528_v43 = vpack.c.bf16 %v204_v41, %v203_v40  ;;  %v205_v50 = vld [vmem:[%s7074_s10 + $0x10] sm:$0xff]  ;;  %v6539_v51 = vpack.c.bf16 %v210_v49, %v209_v48  ;;  %v211_v55 = vld [vmem:[#allocation17] sm:$0xff]  ;;  %v212_v56 = vld [vmem:[#allocation17 + $0x8] sm:$0xff] }
  0xd5   :  { %v254_v19 = vld [vmem:[#allocation20] sm:$0xff]  ;;  %v6544_v53 = vpack.c.bf16 %v206_v52, %v205_v50  ;;  %v6553_v57 = vpack.c.bf16 %v212_v56, %v211_v55  ;;  %v6560_v58 = vld [vmem:[%s7073_s9] ss:$0 sm:$0xff]  ;;  %v213_v4 = vld [vmem:[#allocation17 + $0x10] sm:$0xff] }
  0xd6   :  { %4864 = vmatmul.mubr.msk.f32.vlgmr.msra.gmra.mrb[0].mxu0 %vm248_vm1, %v254_v19  ;;  %4875 = vmatmul.mubr.msk.f32.vlgmr.msra.gmra.mrb[0].mxu1 %vm248_vm1, %v257_v17  ;;  %v255_v30 = vld [vmem:[#allocation22] sm:$0xff]  ;;  %v214_v6 = vld [vmem:[#allocation17 + $0x18] sm:$0xff]  ;;  %v789_v20 = vld [vmem:[#allocation2 + $0x8] sm:$0xff] }
  0xd7   :  { %5485 = vmatpush3.bf16.msra.mxu0 %v6485_v18  ;;  %4885 = vmatprep.mubr.msk.f32.mxu0 %vm6200_vm0, %v6201_v1  ;;  %v6584_v7 = vpack.c.bf16 %v214_v6, %v213_v4  ;;  %v6591_v8 = vld [vmem:[%s7076_s12] ss:$0 sm:$0xff] }
  0xd8   :  { %5486 = vmatprep.subr.bf16.mxu0 %v6199_v0  ;;  %4896 = vmatprep.mubr.msk.f32.mxu1 %vm6200_vm0, %v6201_v1  ;;  %v6618_v24 = vld [vmem:[%s7078_s14] ss:$0 sm:$0xff] }
  0xd9   :  { %5491 = vmatpush3.bf16.msra.mxu1 %v6496_v23 }
  0xda   :  { %5492 = vmatprep.subr.bf16.mxu1 %v6199_v0  ;;  %v256_v54 = vld [vmem:[#allocation23] sm:$0xff] }
  0xdb   :  { %5488 = vmatpush3.bf16.msra.mxu0 %v6500_v26 }
  0xdc   :  { %5495 = vmatprep.subr.bf16.mxu0 %v6199_v0 }
  0xdd   :  { %5494 = vmatpush3.bf16.msra.mxu1 %v6503_v29 }
  0xde   :  { %5501 = vmatprep.subr.bf16.mxu1 %v6199_v0  ;;  %4886 = vmatmul.mubr.msk.f32.vlgmr.msra.gmra.mrb[2].mxu0 %vm248_vm1, %v255_v30 }
  0xdf   :  { %4907 = vmatprep.mubr.msk.f32.mxu0 %vm6200_vm0, %v6201_v1  ;;  %5497 = vmatpush3.bf16.msra.mxu0 %v6512_v33 }
  0xe0   :  { %5498 = vmatprep.subr.bf16.mxu0 %v6199_v0 }
  0xe3   :  { %5500 = vmatpush3.bf16.msra.mxu0 %v6539_v51 }
  0xe4   :  { %5507 = vmatprep.subr.bf16.mxu0 %v6199_v0 }
  0xe6   :  { %4908 = vmatmul.mubr.msk.f32.vlgmr.msra.gmra.mrb[4].mxu0 %vm248_vm1, %v256_v54  ;;  %v1312_v54 = vld [vmem:[#allocation2 + $0x10] sm:$0xff] }
  0xe7   :  { %4929 = vmatprep.mubr.msk.f32.mxu0 %vm6200_vm0, %v6201_v1  ;;  %5509 = vmatpush3.bf16.msra.mxu0 %v6553_v57 }
  0xe8   :  { %5510 = vmatprep.subr.bf16.mxu0 %v6199_v0 }
  0xeb   :  { %5512 = vmatpush3.bf16.msra.mxu0 %v6584_v7 }
  0xec   :  { %5519 = vmatprep.subr.bf16.mxu0 %v6199_v0 }
 0x1a9   :  { %v328_v34 = vpop.f32.mrb[0].mxu0  ;;  %v401_v36 = vpop.f32.mrb[0].mxu1 }
 0x1aa   :  { %v402_v37 = vadd.f32 %v401_v36, %v328_v34  ;;  %v4865_v38 = vpop.f32.mrb[1].mxu0  ;;  %v4876_v39 = vpop.f32.mrb[1].mxu1 }
 0x1ac   :  { %v405_v42 = vadd.f32 %v6519_v35, %v402_v37 }
 0x1ae   :  { %v406_v44 = vmax.f32 %v405_v42, 0.0 }
 0x1b0   :  { %4897 = vmatmul.mubr.msk.f32.vlgmr.msra.gmra.mrb[2].mxu1 %vm248_vm1, %v406_v44 }
 0x1b1   :  { %5503 = vmatpush3.bf16.msra.mxu1 %v6528_v43  ;;  %4918 = vmatprep.mubr.msk.f32.mxu1 %vm6200_vm0, %v6201_v1  ;;  %v476_v46 = vpop.f32.mrb[2].mxu0 }
 0x1b2   :  { %5504 = vmatprep.subr.bf16.mxu1 %v6199_v0  ;;  %v4887_v47 = vpop.f32.mrb[3].mxu0 }
 0x1b5   :  { %5506 = vmatpush3.bf16.msra.mxu1 %v6544_v53 }
 0x1b6   :  { %5513 = vmatprep.subr.bf16.mxu1 %v6199_v0 }
 0x1b9   :  { %v624_v2 = vpop.f32.mrb[4].mxu0 }
 0x1ba   :  { %v4909_v3 = vpop.f32.mrb[5].mxu0 }
 0x283   :  { %v549_v59 = vpop.f32.mrb[2].mxu1 }
 0x284   :  { %v550_v60 = vadd.f32 %v549_v59, %v476_v46  ;;  %v4898_v61 = vpop.f32.mrb[3].mxu1 }
 0x286   :  { %v553_v62 = vadd.f32 %v6560_v58, %v550_v60 }
 0x288   :  { %v554_v63 = vmax.f32 %v553_v62, 0.0 }
 0x28a   :  { %4919 = vmatmul.mubr.msk.f32.vlgmr.msra.gmra.mrb[4].mxu1 %vm248_vm1, %v554_v63 }
 0x28b   :  { %5515 = vmatpush3.bf16.msra.mxu1 %v6469_v5  ;;  %4940 = vmatprep.mubr.msk.f32.mxu1 %vm6200_vm0, %v6201_v1 }
 0x28c   :  { %5516 = vmatprep.subr.bf16.mxu1 %v6199_v0 }
 0x28f   :  { %5518 = vmatpush3.bf16.msra.mxu1 %v6474_v13 }
 0x290   :  { %5525 = vmatprep.subr.bf16.mxu1 %v6199_v0 }
 0x292   :  { %4941 = vmatmul.mubr.msk.f32.vlgmr.msra.gmra.mrb[6].mxu1 %vm248_vm1, %v406_v44 }
 0x293   :  { %5527 = vmatpush3.bf16.msra.mxu1 %v6485_v18  ;;  %4962 = vmatprep.mubr.msk.f32.mxu1 %vm6200_vm0, %v6201_v1 }
 0x294   :  { %5528 = vmatprep.subr.bf16.mxu1 %v6199_v0 }
 0x297   :  { %5530 = vmatpush3.bf16.msra.mxu1 %v6500_v26 }
 0x298   :  { %5537 = vmatprep.subr.bf16.mxu1 %v6199_v0 }
 0x29a   :  { %4963 = vmatmul.mubr.msk.f32.vlgmr.msra.gmra.mrb[8].mxu1 %vm248_vm1, %v554_v63 }
 0x29b   :  { %5539 = vmatpush3.bf16.msra.mxu1 %v6512_v33  ;;  %4984 = vmatprep.mubr.msk.f32.mxu1 %vm6200_vm0, %v6201_v1 }
 0x29c   :  { %5540 = vmatprep.subr.bf16.mxu1 %v6199_v0 }
 0x29f   :  { %5542 = vmatpush3.bf16.msra.mxu1 %v6539_v51 }
 0x2a0   :  { %5549 = vmatprep.subr.bf16.mxu1 %v6199_v0 }
 0x35d   :  { %v697_v10 = vpop.f32.mrb[4].mxu1 }
 0x35e   :  { %v698_v11 = vadd.f32 %v697_v10, %v624_v2  ;;  %v4920_v12 = vpop.f32.mrb[5].mxu1 }
 0x360   :  { %v701_v15 = vadd.f32 %v6591_v8, %v698_v11 }
 0x362   :  { %v702_v16 = vmax.f32 %v701_v15, 0.0 }
 0x364   :  { %4930 = vmatmul.mubr.msk.f32.vlgmr.msra.gmra.mrb[6].mxu0 %vm248_vm1, %v702_v16  ;;  %4985 = vmatmul.mubr.msk.f32.vlgmr.msra.gmra.mrb[10].mxu1 %vm248_vm1, %v702_v16 }
 0x365   :  { %v856_v17 = vpop.f32.mrb[6].mxu1  ;;  %5521 = vmatpush3.bf16.msra.mxu0 %v6471_v9  ;;  %4951 = vmatprep.mubr.msk.f32.mxu0 %vm6200_vm0, %v6201_v1 }
 0x366   :  { %v4942_v19 = vpop.f32.mrb[7].mxu1  ;;  %5522 = vmatprep.subr.bf16.mxu0 %v6199_v0  ;;  %5551 = vmatpush3.bf16.msra.mxu1 %v6553_v57 }
 0x367   :  { %5552 = vmatprep.subr.bf16.mxu1 %v6199_v0  ;;  %5006 = vmatprep.mubr.msk.f32.mxu1 %vm6200_vm0, %v6201_v1 }
 0x369   :  { %5524 = vmatpush3.bf16.msra.mxu0 %v6479_v14 }
 0x36a   :  { %5531 = vmatprep.subr.bf16.mxu0 %v6199_v0  ;;  %5554 = vmatpush3.bf16.msra.mxu1 %v6584_v7 }
 0x36b   :  { %5561 = vmatprep.subr.bf16.mxu1 %v6199_v0 }
 0x36c   :  { %4952 = vmatmul.mubr.msk.f32.vlgmr.msra.gmra.mrb[8].mxu0 %vm248_vm1, %v789_v20 }
 0x36d   :  { %v1001_v21 = vpop.f32.mrb[8].mxu1  ;;  %5533 = vmatpush3.bf16.msra.mxu0 %v6496_v23  ;;  %4973 = vmatprep.mubr.msk.f32.mxu0 %vm6200_vm0, %v6201_v1 }
 0x36e   :  { %v4964_v22 = vpop.f32.mrb[9].mxu1  ;;  %5534 = vmatprep.subr.bf16.mxu0 %v6199_v0 }
 0x371   :  { %5536 = vmatpush3.bf16.msra.mxu0 %v6503_v29 }
 0x372   :  { %5543 = vmatprep.subr.bf16.mxu0 %v6199_v0 }
 0x437   :  { %v772_v25 = vpop.f32.mrb[6].mxu0  ;;  %v1146_v27 = vpop.f32.mrb[10].mxu1 }
 0x438   :  { %v6621_v28 = vadd.f32 %v6618_v24, %v772_v25  ;;  %v4931_v30 = vpop.f32.mrb[7].mxu0  ;;  %v4986_v31 = vpop.f32.mrb[11].mxu1 }
 0x439   :  { %v1835_v31 = vld [vmem:[#allocation2 + $0x18] sm:$0xff] }
 0x43a   :  { %776 = vmax.xlane.f32.xlu0 %v6621_v28 }
 0x43f   :  { %v929_v32 = vpop.f32.mrb[8].mxu0 }
 0x440   :  { %v930_v34 = vadd.f32 %v929_v32, %v856_v17  ;;  %v4953_v36 = vpop.f32.mrb[9].mxu0 }
 0x442   :  { %v933_v37 = vadd.f32 %v6519_v35, %v930_v34 }
 0x444   :  { %v934_v38 = vmax.f32 %v933_v37, 0.0 }
 0x446   :  { %4974 = vmatmul.mubr.msk.f32.vlgmr.msra.gmra.mrb[10].mxu0 %vm248_vm1, %v934_v38 }
 0x447   :  { %5545 = vmatpush3.bf16.msra.mxu0 %v6528_v43  ;;  %4995 = vmatprep.mubr.msk.f32.mxu0 %vm6200_vm0, %v6201_v1 }
 0x448   :  { %5546 = vmatprep.subr.bf16.mxu0 %v6199_v0 }
 0x44b   :  { %5548 = vmatpush3.bf16.msra.mxu0 %v6544_v53 }
 0x44c   :  { %5555 = vmatprep.subr.bf16.mxu0 %v6199_v0 }
 0x519   :  { %v1074_v39 = vpop.f32.mrb[10].mxu0 }
 0x51a   :  { %v1075_v40 = vadd.f32 %v1074_v39, %v1001_v21  ;;  %v4975_v41 = vpop.f32.mrb[11].mxu0 }
 0x51c   :  { %v1078_v42 = vadd.f32 %v6560_v58, %v1075_v40 }
 0x51e   :  { %v1079_v44 = vmax.f32 %v1078_v42, 0.0 }
 0x520   :  { %4996 = vmatmul.mubr.msk.f32.vlgmr.msra.gmra.mrb[12].mxu0 %vm248_vm1, %v1079_v44 }
 0x521   :  { %5557 = vmatpush3.bf16.msra.mxu0 %v6469_v5  ;;  %5017 = vmatprep.mubr.msk.f32.mxu0 %vm6200_vm0, %v6201_v1 }
 0x522   :  { %5558 = vmatprep.subr.bf16.mxu0 %v6199_v0 }
 0x525   :  { %5560 = vmatpush3.bf16.msra.mxu0 %v6474_v13 }
 0x526   :  { %5567 = vmatprep.subr.bf16.mxu0 %v6199_v0 }
 0x528   :  { %5018 = vmatmul.mubr.msk.f32.vlgmr.msra.gmra.mrb[14].mxu0 %vm248_vm1, %v934_v38 }
 0x529   :  { %5569 = vmatpush3.bf16.msra.mxu0 %v6485_v18  ;;  %5039 = vmatprep.mubr.msk.f32.mxu0 %vm6200_vm0, %v6201_v1 }
 0x52a   :  { %5570 = vmatprep.subr.bf16.mxu0 %v6199_v0 }
 0x52d   :  { %5572 = vmatpush3.bf16.msra.mxu0 %v6500_v26 }
 0x52e   :  { %5579 = vmatprep.subr.bf16.mxu0 %v6199_v0 }
 0x530   :  { %5040 = vmatmul.mubr.msk.f32.vlgmr.msra.gmra.mrb[16].mxu0 %vm248_vm1, %v1079_v44 }
 0x531   :  { %5581 = vmatpush3.bf16.msra.mxu0 %v6512_v33  ;;  %5061 = vmatprep.mubr.msk.f32.mxu0 %vm6200_vm0, %v6201_v1 }
 0x532   :  { %5582 = vmatprep.subr.bf16.mxu0 %v6199_v0 }
 0x535   :  { %5584 = vmatpush3.bf16.msra.mxu0 %v6539_v51 }
 0x536   :  { %5591 = vmatprep.subr.bf16.mxu0 %v6199_v0 }
 0x5f3   :  { %v1219_v45 = vpop.f32.mrb[12].mxu0 }
 0x5f4   :  { %v1220_v46 = vadd.f32 %v1219_v45, %v1146_v27  ;;  %v4997_v47 = vpop.f32.mrb[13].mxu0 }
 0x5f6   :  { %v1223_v48 = vadd.f32 %v6591_v8, %v1220_v46 }
 0x5f8   :  { %v1224_v49 = vmax.f32 %v1223_v48, 0.0 }
 0x5fa   :  { %5007 = vmatmul.mubr.msk.f32.vlgmr.msra.gmra.mrb[12].mxu1 %vm248_vm1, %v1224_v49  ;;  %5062 = vmatmul.mubr.msk.f32.vlgmr.msra.gmra.mrb[18].mxu0 %vm248_vm1, %v1224_v49 }
 0x5fb   :  { %v1379_v50 = vpop.f32.mrb[14].mxu0  ;;  %5563 = vmatpush3.bf16.msra.mxu1 %v6471_v9  ;;  %5028 = vmatprep.mubr.msk.f32.mxu1 %vm6200_vm0, %v6201_v1 }
 0x5fc   :  { %v5019_v52 = vpop.f32.mrb[15].mxu0  ;;  %5564 = vmatprep.subr.bf16.mxu1 %v6199_v0  ;;  %5593 = vmatpush3.bf16.msra.mxu0 %v6553_v57 }
 0x5fd   :  { %5594 = vmatprep.subr.bf16.mxu0 %v6199_v0  ;;  %5083 = vmatprep.mubr.msk.f32.mxu0 %vm6200_vm0, %v6201_v1 }
 0x5ff   :  { %5566 = vmatpush3.bf16.msra.mxu1 %v6479_v14 }
 0x600   :  { %5573 = vmatprep.subr.bf16.mxu1 %v6199_v0  ;;  %5596 = vmatpush3.bf16.msra.mxu0 %v6584_v7 }
 0x601   :  { %5603 = vmatprep.subr.bf16.mxu0 %v6199_v0 }
 0x602   :  { %5029 = vmatmul.mubr.msk.f32.vlgmr.msra.gmra.mrb[14].mxu1 %vm248_vm1, %v1312_v54 }
 0x603   :  { %v1524_v55 = vpop.f32.mrb[16].mxu0  ;;  %5575 = vmatpush3.bf16.msra.mxu1 %v6496_v23  ;;  %5050 = vmatprep.mubr.msk.f32.mxu1 %vm6200_vm0, %v6201_v1 }
 0x604   :  { %v5041_v56 = vpop.f32.mrb[17].mxu0  ;;  %5576 = vmatprep.subr.bf16.mxu1 %v6199_v0 }
 0x607   :  { %5578 = vmatpush3.bf16.msra.mxu1 %v6503_v29 }
 0x608   :  { %5585 = vmatprep.subr.bf16.mxu1 %v6199_v0 }
 0x6cd   :  { %v1294_v59 = vpop.f32.mrb[12].mxu1  ;;  %v1669_v60 = vpop.f32.mrb[18].mxu0 }
 0x6ce   :  { %v6677_v61 = vadd.f32 %v6618_v24, %v1294_v59  ;;  %v5008_v62 = vpop.f32.mrb[13].mxu1  ;;  %v5063_v63 = vpop.f32.mrb[19].mxu0 }
 0x6d0   :  { %1298 = vmax.xlane.f32.xlu0 %v6677_v61 }
 0x6d5   :  { %v1452_v2 = vpop.f32.mrb[14].mxu1 }
 0x6d6   :  { %v1453_v3 = vadd.f32 %v1452_v2, %v1379_v50  ;;  %v5030_v4 = vpop.f32.mrb[15].mxu1  ;;  %v2358_v2 = vld [vmem:[#allocation2 + $0x20] sm:$0xff] }
 0x6d8   :  { %v1456_v6 = vadd.f32 %v6519_v35, %v1453_v3 }
 0x6da   :  { %v1457_v10 = vmax.f32 %v1456_v6, 0.0 }
 0x6dc   :  { %5051 = vmatmul.mubr.msk.f32.vlgmr.msra.gmra.mrb[16].mxu1 %vm248_vm1, %v1457_v10 }
 0x6dd   :  { %5587 = vmatpush3.bf16.msra.mxu1 %v6528_v43  ;;  %5072 = vmatprep.mubr.msk.f32.mxu1 %vm6200_vm0, %v6201_v1 }
 0x6de   :  { %5588 = vmatprep.subr.bf16.mxu1 %v6199_v0 }
 0x6e1   :  { %5590 = vmatpush3.bf16.msra.mxu1 %v6544_v53 }
 0x6e2   :  { %5597 = vmatprep.subr.bf16.mxu1 %v6199_v0 }
 0x7af   :  { %v1597_v11 = vpop.f32.mrb[16].mxu1 }
 0x7b0   :  { %v1598_v12 = vadd.f32 %v1597_v11, %v1524_v55  ;;  %v5052_v15 = vpop.f32.mrb[17].mxu1 }
 0x7b2   :  { %v1601_v16 = vadd.f32 %v6560_v58, %v1598_v12 }
 0x7b4   :  { %v1602_v17 = vmax.f32 %v1601_v16, 0.0 }
 0x7b6   :  { %5073 = vmatmul.mubr.msk.f32.vlgmr.msra.gmra.mrb[18].mxu1 %vm248_vm1, %v1602_v17 }
 0x7b7   :  { %5599 = vmatpush3.bf16.msra.mxu1 %v6469_v5  ;;  %5094 = vmatprep.mubr.msk.f32.mxu1 %vm6200_vm0, %v6201_v1 }
 0x7b8   :  { %5600 = vmatprep.subr.bf16.mxu1 %v6199_v0 }
 0x7bb   :  { %5602 = vmatpush3.bf16.msra.mxu1 %v6474_v13 }
 0x7bc   :  { %5609 = vmatprep.subr.bf16.mxu1 %v6199_v0 }
 0x7be   :  { %5095 = vmatmul.mubr.msk.f32.vlgmr.msra.gmra.mrb[20].mxu1 %vm248_vm1, %v1457_v10 }
 0x7bf   :  { %5611 = vmatpush3.bf16.msra.mxu1 %v6485_v18  ;;  %5116 = vmatprep.mubr.msk.f32.mxu1 %vm6200_vm0, %v6201_v1 }
 0x7c0   :  { %5612 = vmatprep.subr.bf16.mxu1 %v6199_v0 }
 0x7c3   :  { %5614 = vmatpush3.bf16.msra.mxu1 %v6500_v26 }
 0x7c4   :  { %5621 = vmatprep.subr.bf16.mxu1 %v6199_v0 }
 0x7c6   :  { %5117 = vmatmul.mubr.msk.f32.vlgmr.msra.gmra.mrb[22].mxu1 %vm248_vm1, %v1602_v17 }
 0x7c7   :  { %5623 = vmatpush3.bf16.msra.mxu1 %v6512_v33  ;;  %5138 = vmatprep.mubr.msk.f32.mxu1 %vm6200_vm0, %v6201_v1 }
 0x7c8   :  { %5624 = vmatprep.subr.bf16.mxu1 %v6199_v0 }
 0x7cb   :  { %5626 = vmatpush3.bf16.msra.mxu1 %v6539_v51 }
 0x7cc   :  { %5633 = vmatprep.subr.bf16.mxu1 %v6199_v0 }
 0x889   :  { %v1742_v19 = vpop.f32.mrb[18].mxu1 }
 0x88a   :  { %v1743_v20 = vadd.f32 %v1742_v19, %v1669_v60  ;;  %v5074_v21 = vpop.f32.mrb[19].mxu1 }
 0x88c   :  { %v1746_v22 = vadd.f32 %v6591_v8, %v1743_v20 }
 0x88e   :  { %v1747_v25 = vmax.f32 %v1746_v22, 0.0 }
 0x890   :  { %5084 = vmatmul.mubr.msk.f32.vlgmr.msra.gmra.mrb[20].mxu0 %vm248_vm1, %v1747_v25  ;;  %5139 = vmatmul.mubr.msk.f32.vlgmr.msra.gmra.mrb[24].mxu1 %vm248_vm1, %v1747_v25 }
 0x891   :  { %v1902_v27 = vpop.f32.mrb[20].mxu1  ;;  %5605 = vmatpush3.bf16.msra.mxu0 %v6471_v9  ;;  %5105 = vmatprep.mubr.msk.f32.mxu0 %vm6200_vm0, %v6201_v1 }
 0x892   :  { %v5096_v30 = vpop.f32.mrb[21].mxu1  ;;  %5606 = vmatprep.subr.bf16.mxu0 %v6199_v0  ;;  %5635 = vmatpush3.bf16.msra.mxu1 %v6553_v57 }
 0x893   :  { %5636 = vmatprep.subr.bf16.mxu1 %v6199_v0  ;;  %5160 = vmatprep.mubr.msk.f32.mxu1 %vm6200_vm0, %v6201_v1 }
 0x895   :  { %5608 = vmatpush3.bf16.msra.mxu0 %v6479_v14 }
 0x896   :  { %5615 = vmatprep.subr.bf16.mxu0 %v6199_v0  ;;  %5638 = vmatpush3.bf16.msra.mxu1 %v6584_v7 }
 0x897   :  { %5645 = vmatprep.subr.bf16.mxu1 %v6199_v0 }
 0x898   :  { %5106 = vmatmul.mubr.msk.f32.vlgmr.msra.gmra.mrb[22].mxu0 %vm248_vm1, %v1835_v31 }
 0x899   :  { %v2047_v32 = vpop.f32.mrb[22].mxu1  ;;  %5617 = vmatpush3.bf16.msra.mxu0 %v6496_v23  ;;  %5127 = vmatprep.mubr.msk.f32.mxu0 %vm6200_vm0, %v6201_v1 }
 0x89a   :  { %v5118_v34 = vpop.f32.mrb[23].mxu1  ;;  %5618 = vmatprep.subr.bf16.mxu0 %v6199_v0 }
 0x89d   :  { %5620 = vmatpush3.bf16.msra.mxu0 %v6503_v29 }
 0x89e   :  { %5627 = vmatprep.subr.bf16.mxu0 %v6199_v0 }
 0x963   :  { %v1817_v36 = vpop.f32.mrb[20].mxu0  ;;  %v2192_v37 = vpop.f32.mrb[24].mxu1 }
 0x964   :  { %v6733_v38 = vadd.f32 %v6618_v24, %v1817_v36  ;;  %v5085_v39 = vpop.f32.mrb[21].mxu0  ;;  %v5140_v40 = vpop.f32.mrb[25].mxu1 }
 0x966   :  { %1821 = vmax.xlane.f32.xlu1 %v6733_v38 }
 0x96b   :  { %v1975_v41 = vpop.f32.mrb[22].mxu0 }
 0x96c   :  { %v1976_v42 = vadd.f32 %v1975_v41, %v1902_v27  ;;  %v5107_v44 = vpop.f32.mrb[23].mxu0 }
 0x96e   :  { %v1979_v45 = vadd.f32 %v6519_v35, %v1976_v42  ;;  %v2881_v42 = vld [vmem:[#allocation2 + $0x28] sm:$0xff] }
 0x970   :  { %v1980_v46 = vmax.f32 %v1979_v45, 0.0 }
 0x972   :  { %5128 = vmatmul.mubr.msk.f32.vlgmr.msra.gmra.mrb[24].mxu0 %vm248_vm1, %v1980_v46 }
 0x973   :  { %5629 = vmatpush3.bf16.msra.mxu0 %v6528_v43  ;;  %5149 = vmatprep.mubr.msk.f32.mxu0 %vm6200_vm0, %v6201_v1 }
 0x974   :  { %5630 = vmatprep.subr.bf16.mxu0 %v6199_v0 }
 0x977   :  { %5632 = vmatpush3.bf16.msra.mxu0 %v6544_v53 }
 0x978   :  { %5639 = vmatprep.subr.bf16.mxu0 %v6199_v0 }
 0xa45   :  { %v2120_v47 = vpop.f32.mrb[24].mxu0 }
 0xa46   :  { %v2121_v48 = vadd.f32 %v2120_v47, %v2047_v32  ;;  %v5129_v49 = vpop.f32.mrb[25].mxu0 }
 0xa48   :  { %v2124_v50 = vadd.f32 %v6560_v58, %v2121_v48 }
 0xa4a   :  { %v2125_v52 = vmax.f32 %v2124_v50, 0.0 }
 0xa4c   :  { %5150 = vmatmul.mubr.msk.f32.vlgmr.msra.gmra.mrb[26].mxu0 %vm248_vm1, %v2125_v52 }
 0xa4d   :  { %5641 = vmatpush3.bf16.msra.mxu0 %v6469_v5  ;;  %5171 = vmatprep.mubr.msk.f32.mxu0 %vm6200_vm0, %v6201_v1 }
 0xa4e   :  { %5642 = vmatprep.subr.bf16.mxu0 %v6199_v0 }
 0xa51   :  { %5644 = vmatpush3.bf16.msra.mxu0 %v6474_v13 }
 0xa52   :  { %5651 = vmatprep.subr.bf16.mxu0 %v6199_v0 }
 0xa54   :  { %5172 = vmatmul.mubr.msk.f32.vlgmr.msra.gmra.mrb[28].mxu0 %vm248_vm1, %v1980_v46 }
 0xa55   :  { %5653 = vmatpush3.bf16.msra.mxu0 %v6485_v18  ;;  %5193 = vmatprep.mubr.msk.f32.mxu0 %vm6200_vm0, %v6201_v1 }
 0xa56   :  { %5654 = vmatprep.subr.bf16.mxu0 %v6199_v0 }
 0xa59   :  { %5656 = vmatpush3.bf16.msra.mxu0 %v6500_v26 }
 0xa5a   :  { %5663 = vmatprep.subr.bf16.mxu0 %v6199_v0 }
 0xa5c   :  { %5194 = vmatmul.mubr.msk.f32.vlgmr.msra.gmra.mrb[30].mxu0 %vm248_vm1, %v2125_v52 }
 0xa5d   :  { %5665 = vmatpush3.bf16.msra.mxu0 %v6512_v33  ;;  %5215 = vmatprep.mubr.msk.f32.mxu0 %vm6200_vm0, %v6201_v1 }
 0xa5e   :  { %5666 = vmatprep.subr.bf16.mxu0 %v6199_v0 }
 0xa61   :  { %5668 = vmatpush3.bf16.msra.mxu0 %v6539_v51 }
 0xa62   :  { %5675 = vmatprep.subr.bf16.mxu0 %v6199_v0 }
 0xb1f   :  { %v2265_v54 = vpop.f32.mrb[26].mxu0 }
 0xb20   :  { %v2266_v55 = vadd.f32 %v2265_v54, %v2192_v37  ;;  %v5151_v56 = vpop.f32.mrb[27].mxu0 }
 0xb22   :  { %v2269_v59 = vadd.f32 %v6591_v8, %v2266_v55 }
 0xb24   :  { %v2270_v60 = vmax.f32 %v2269_v59, 0.0 }
 0xb26   :  { %5161 = vmatmul.mubr.msk.f32.vlgmr.msra.gmra.mrb[26].mxu1 %vm248_vm1, %v2270_v60  ;;  %5216 = vmatmul.mubr.msk.f32.vlgmr.msra.gmra.mrb[32].mxu0 %vm248_vm1, %v2270_v60 }
 0xb27   :  { %v2425_v62 = vpop.f32.mrb[28].mxu0  ;;  %5647 = vmatpush3.bf16.msra.mxu1 %v6471_v9  ;;  %5182 = vmatprep.mubr.msk.f32.mxu1 %vm6200_vm0, %v6201_v1 }
 0xb28   :  { %v5173_v63 = vpop.f32.mrb[29].mxu0  ;;  %5648 = vmatprep.subr.bf16.mxu1 %v6199_v0  ;;  %5677 = vmatpush3.bf16.msra.mxu0 %v6553_v57 }
 0xb29   :  { %5678 = vmatprep.subr.bf16.mxu0 %v6199_v0  ;;  %5237 = vmatprep.mubr.msk.f32.mxu0 %vm6200_vm0, %v6201_v1 }
 0xb2b   :  { %5650 = vmatpush3.bf16.msra.mxu1 %v6479_v14 }
 0xb2c   :  { %5657 = vmatprep.subr.bf16.mxu1 %v6199_v0  ;;  %5680 = vmatpush3.bf16.msra.mxu0 %v6584_v7 }
 0xb2d   :  { %5687 = vmatprep.subr.bf16.mxu0 %v6199_v0 }
 0xb2e   :  { %5183 = vmatmul.mubr.msk.f32.vlgmr.msra.gmra.mrb[28].mxu1 %vm248_vm1, %v2358_v2 }
 0xb2f   :  { %v2570_v3 = vpop.f32.mrb[30].mxu0  ;;  %5659 = vmatpush3.bf16.msra.mxu1 %v6496_v23  ;;  %5204 = vmatprep.mubr.msk.f32.mxu1 %vm6200_vm0, %v6201_v1 }
 0xb30   :  { %v5195_v4 = vpop.f32.mrb[31].mxu0  ;;  %5660 = vmatprep.subr.bf16.mxu1 %v6199_v0 }
 0xb33   :  { %5662 = vmatpush3.bf16.msra.mxu1 %v6503_v29 }
 0xb34   :  { %5669 = vmatprep.subr.bf16.mxu1 %v6199_v0 }
 0xbf9   :  { %v2340_v6 = vpop.f32.mrb[26].mxu1  ;;  %v2715_v10 = vpop.f32.mrb[32].mxu0 }
 0xbfa   :  { %v6789_v11 = vadd.f32 %v6618_v24, %v2340_v6  ;;  %v5162_v12 = vpop.f32.mrb[27].mxu1  ;;  %v5217_v15 = vpop.f32.mrb[33].mxu0 }
 0xbfc   :  { %2344 = vmax.xlane.f32.xlu1 %v6789_v11 }
 0xc01   :  { %v2498_v16 = vpop.f32.mrb[28].mxu1 }
 0xc02   :  { %v2499_v17 = vadd.f32 %v2498_v16, %v2425_v62  ;;  %v5184_v19 = vpop.f32.mrb[29].mxu1 }
 0xc03   :  { %v3404_v19 = vld [vmem:[#allocation2 + $0x30] sm:$0xff] }
 0xc04   :  { %v2502_v20 = vadd.f32 %v6519_v35, %v2499_v17 }
 0xc06   :  { %v2503_v21 = vmax.f32 %v2502_v20, 0.0 }
 0xc08   :  { %5205 = vmatmul.mubr.msk.f32.vlgmr.msra.gmra.mrb[30].mxu1 %vm248_vm1, %v2503_v21 }
 0xc09   :  { %5671 = vmatpush3.bf16.msra.mxu1 %v6528_v43  ;;  %5226 = vmatprep.mubr.msk.f32.mxu1 %vm6200_vm0, %v6201_v1 }
 0xc0a   :  { %5672 = vmatprep.subr.bf16.mxu1 %v6199_v0 }
 0xc0d   :  { %5674 = vmatpush3.bf16.msra.mxu1 %v6544_v53 }
 0xc0e   :  { %5681 = vmatprep.subr.bf16.mxu1 %v6199_v0 }
 0xcdb   :  { %v2643_v22 = vpop.f32.mrb[30].mxu1 }
 0xcdc   :  { %v2644_v25 = vadd.f32 %v2643_v22, %v2570_v3  ;;  %v5206_v27 = vpop.f32.mrb[31].mxu1 }
 0xcde   :  { %v2647_v30 = vadd.f32 %v6560_v58, %v2644_v25 }
 0xce0   :  { %v2648_v31 = vmax.f32 %v2647_v30, 0.0 }
 0xce2   :  { %5227 = vmatmul.mubr.msk.f32.vlgmr.msra.gmra.mrb[32].mxu1 %vm248_vm1, %v2648_v31 }
 0xce3   :  { %5683 = vmatpush3.bf16.msra.mxu1 %v6469_v5  ;;  %5248 = vmatprep.mubr.msk.f32.mxu1 %vm6200_vm0, %v6201_v1 }
 0xce4   :  { %5684 = vmatprep.subr.bf16.mxu1 %v6199_v0 }
 0xce7   :  { %5686 = vmatpush3.bf16.msra.mxu1 %v6474_v13 }
 0xce8   :  { %5693 = vmatprep.subr.bf16.mxu1 %v6199_v0 }
 0xcea   :  { %5249 = vmatmul.mubr.msk.f32.vlgmr.msra.gmra.mrb[34].mxu1 %vm248_vm1, %v2503_v21 }
 0xceb   :  { %5695 = vmatpush3.bf16.msra.mxu1 %v6485_v18  ;;  %5270 = vmatprep.mubr.msk.f32.mxu1 %vm6200_vm0, %v6201_v1 }
 0xcec   :  { %5696 = vmatprep.subr.bf16.mxu1 %v6199_v0 }
 0xcef   :  { %5698 = vmatpush3.bf16.msra.mxu1 %v6500_v26 }
 0xcf0   :  { %5705 = vmatprep.subr.bf16.mxu1 %v6199_v0 }
 0xcf2   :  { %5271 = vmatmul.mubr.msk.f32.vlgmr.msra.gmra.mrb[36].mxu1 %vm248_vm1, %v2648_v31 }
 0xcf3   :  { %5707 = vmatpush3.bf16.msra.mxu1 %v6512_v33  ;;  %5292 = vmatprep.mubr.msk.f32.mxu1 %vm6200_vm0, %v6201_v1 }
 0xcf4   :  { %5708 = vmatprep.subr.bf16.mxu1 %v6199_v0 }
 0xcf7   :  { %5710 = vmatpush3.bf16.msra.mxu1 %v6539_v51 }
 0xcf8   :  { %5717 = vmatprep.subr.bf16.mxu1 %v6199_v0 }
 0xdb5   :  { %v2788_v32 = vpop.f32.mrb[32].mxu1 }
 0xdb6   :  { %v2789_v34 = vadd.f32 %v2788_v32, %v2715_v10  ;;  %v5228_v36 = vpop.f32.mrb[33].mxu1 }
 0xdb8   :  { %v2792_v37 = vadd.f32 %v6591_v8, %v2789_v34 }
 0xdba   :  { %v2793_v39 = vmax.f32 %v2792_v37, 0.0 }
 0xdbc   :  { %5238 = vmatmul.mubr.msk.f32.vlgmr.msra.gmra.mrb[34].mxu0 %vm248_vm1, %v2793_v39  ;;  %5293 = vmatmul.mubr.msk.f32.vlgmr.msra.gmra.mrb[38].mxu1 %vm248_vm1, %v2793_v39 }
 0xdbd   :  { %v2948_v40 = vpop.f32.mrb[34].mxu1  ;;  %5689 = vmatpush3.bf16.msra.mxu0 %v6471_v9  ;;  %5259 = vmatprep.mubr.msk.f32.mxu0 %vm6200_vm0, %v6201_v1 }
 0xdbe   :  { %v5250_v41 = vpop.f32.mrb[35].mxu1  ;;  %5690 = vmatprep.subr.bf16.mxu0 %v6199_v0  ;;  %5719 = vmatpush3.bf16.msra.mxu1 %v6553_v57 }
 0xdbf   :  { %5720 = vmatprep.subr.bf16.mxu1 %v6199_v0  ;;  %5314 = vmatprep.mubr.msk.f32.mxu1 %vm6200_vm0, %v6201_v1 }
 0xdc1   :  { %5692 = vmatpush3.bf16.msra.mxu0 %v6479_v14 }
 0xdc2   :  { %5699 = vmatprep.subr.bf16.mxu0 %v6199_v0  ;;  %5722 = vmatpush3.bf16.msra.mxu1 %v6584_v7 }
 0xdc3   :  { %5729 = vmatprep.subr.bf16.mxu1 %v6199_v0 }
 0xdc4   :  { %5260 = vmatmul.mubr.msk.f32.vlgmr.msra.gmra.mrb[36].mxu0 %vm248_vm1, %v2881_v42 }
 0xdc5   :  { %v3093_v44 = vpop.f32.mrb[36].mxu1  ;;  %5701 = vmatpush3.bf16.msra.mxu0 %v6496_v23  ;;  %5281 = vmatprep.mubr.msk.f32.mxu0 %vm6200_vm0, %v6201_v1 }
 0xdc6   :  { %v5272_v45 = vpop.f32.mrb[37].mxu1  ;;  %5702 = vmatprep.subr.bf16.mxu0 %v6199_v0 }
 0xdc9   :  { %5704 = vmatpush3.bf16.msra.mxu0 %v6503_v29 }
 0xdca   :  { %5711 = vmatprep.subr.bf16.mxu0 %v6199_v0 }
 0xe8f   :  { %v2863_v46 = vpop.f32.mrb[34].mxu0  ;;  %v3238_v47 = vpop.f32.mrb[38].mxu1 }
 0xe90   :  { %v6845_v48 = vadd.f32 %v6618_v24, %v2863_v46  ;;  %v5239_v49 = vpop.f32.mrb[35].mxu0  ;;  %v5294_v50 = vpop.f32.mrb[39].mxu1 }
 0xe91   :  { %v1822_v46 = vpop.xlane.xlu1 %1821 }
 0xe92   :  { %2867 = vmax.xlane.f32.xlu0 %v6845_v48  ;;  %v1823_v49 = vsub.f32 %v6733_v38, %v1822_v46 }
 0xe94   :  { %v1824_v50 = vmul.f32 1.442695, %v1823_v49 }
 0xe97   :  { %v3021_v52 = vpop.f32.mrb[36].mxu0 }
 0xe98   :  { %v3022_v54 = vadd.f32 %v3021_v52, %v2948_v40  ;;  %v5261_v55 = vpop.f32.mrb[37].mxu0 }
 0xe9a   :  { %v3025_v56 = vadd.f32 %v6519_v35, %v3022_v54 }
 0xe9c   :  { %v3026_v59 = vmax.f32 %v3025_v56, 0.0 }
 0xe9e   :  { %5282 = vmatmul.mubr.msk.f32.vlgmr.msra.gmra.mrb[38].mxu0 %vm248_vm1, %v3026_v59 }
 0xe9f   :  { %5713 = vmatpush3.bf16.msra.mxu0 %v6528_v43  ;;  %5303 = vmatprep.mubr.msk.f32.mxu0 %vm6200_vm0, %v6201_v1 }
 0xea0   :  { %5714 = vmatprep.subr.bf16.mxu0 %v6199_v0 }
 0xea3   :  { %5716 = vmatpush3.bf16.msra.mxu0 %v6544_v53 }
 0xea4   :  { %5723 = vmatprep.subr.bf16.mxu0 %v6199_v0 }
 0xf71   :  { %v3166_v60 = vpop.f32.mrb[38].mxu0 }
 0xf72   :  { %v3167_v62 = vadd.f32 %v3166_v60, %v3093_v44  ;;  %v5283_v63 = vpop.f32.mrb[39].mxu0 }
 0xf74   :  { %v3170_v2 = vadd.f32 %v6560_v58, %v3167_v62 }
 0xf76   :  { %v3171_v3 = vmax.f32 %v3170_v2, 0.0 }
 0xf78   :  { %5304 = vmatmul.mubr.msk.f32.vlgmr.msra.gmra.mrb[40].mxu0 %vm248_vm1, %v3171_v3 }
 0xf79   :  { %5725 = vmatpush3.bf16.msra.mxu0 %v6469_v5  ;;  %5325 = vmatprep.mubr.msk.f32.mxu0 %vm6200_vm0, %v6201_v1 }
 0xf7a   :  { %5726 = vmatprep.subr.bf16.mxu0 %v6199_v0 }
 0xf7d   :  { %5728 = vmatpush3.bf16.msra.mxu0 %v6474_v13 }
 0xf7e   :  { %5735 = vmatprep.subr.bf16.mxu0 %v6199_v0 }
 0xf80   :  { %5326 = vmatmul.mubr.msk.f32.vlgmr.msra.gmra.mrb[42].mxu0 %vm248_vm1, %v3026_v59 }
 0xf81   :  { %5737 = vmatpush3.bf16.msra.mxu0 %v6485_v18  ;;  %5347 = vmatprep.mubr.msk.f32.mxu0 %vm6200_vm0, %v6201_v1 }
 0xf82   :  { %5738 = vmatprep.subr.bf16.mxu0 %v6199_v0 }
 0xf85   :  { %5740 = vmatpush3.bf16.msra.mxu0 %v6500_v26 }
 0xf86   :  { %5747 = vmatprep.subr.bf16.mxu0 %v6199_v0 }
 0xf88   :  { %5348 = vmatmul.mubr.msk.f32.vlgmr.msra.gmra.mrb[44].mxu0 %vm248_vm1, %v3171_v3 }
 0xf89   :  { %5749 = vmatpush3.bf16.msra.mxu0 %v6512_v33  ;;  %5369 = vmatprep.mubr.msk.f32.mxu0 %vm6200_vm0, %v6201_v1 }
 0xf8a   :  { %5750 = vmatprep.subr.bf16.mxu0 %v6199_v0 }
 0xf8d   :  { %5752 = vmatpush3.bf16.msra.mxu0 %v6539_v51 }
 0xf8e   :  { %5759 = vmatprep.subr.bf16.mxu0 %v6199_v0 }
0x104b   :  { %v3311_v4 = vpop.f32.mrb[40].mxu0 }
0x104c   :  { %v3312_v6 = vadd.f32 %v3311_v4, %v3238_v47  ;;  %v5305_v10 = vpop.f32.mrb[41].mxu0 }
0x104e   :  { %v3315_v12 = vadd.f32 %v6591_v8, %v3312_v6  ;;  %v5858_v6 = vld [vmem:[%s7070_s6] ss:$0 sm:$0xff] }
0x1050   :  { %v3316_v15 = vmax.f32 %v3315_v12, 0.0 }
0x1052   :  { %5315 = vmatmul.mubr.msk.f32.vlgmr.msra.gmra.mrb[40].mxu1 %vm248_vm1, %v3316_v15  ;;  %5370 = vmatmul.mubr.msk.f32.vlgmr.msra.gmra.mrb[46].mxu0 %vm248_vm1, %v3316_v15 }
0x1053   :  { %v3471_v16 = vpop.f32.mrb[42].mxu0  ;;  %5731 = vmatpush3.bf16.msra.mxu1 %v6471_v9  ;;  %5336 = vmatprep.mubr.msk.f32.mxu1 %vm6200_vm0, %v6201_v1 }
0x1054   :  { %v5327_v17 = vpop.f32.mrb[43].mxu0  ;;  %5732 = vmatprep.subr.bf16.mxu1 %v6199_v0  ;;  %5761 = vmatpush3.bf16.msra.mxu0 %v6553_v57 }
0x1055   :  { %5762 = vmatprep.subr.bf16.mxu0 %v6199_v0  ;;  %5391 = vmatprep.mubr.msk.f32.mxu0 %vm6200_vm0, %v6201_v1 }
0x1057   :  { %5734 = vmatpush3.bf16.msra.mxu1 %v6479_v14 }
0x1058   :  { %5741 = vmatprep.subr.bf16.mxu1 %v6199_v0  ;;  %5764 = vmatpush3.bf16.msra.mxu0 %v6584_v7 }
0x1059   :  { %5771 = vmatprep.subr.bf16.mxu0 %v6199_v0 }
0x105a   :  { %5337 = vmatmul.mubr.msk.f32.vlgmr.msra.gmra.mrb[42].mxu1 %vm248_vm1, %v3404_v19 }
0x105b   :  { %v3616_v20 = vpop.f32.mrb[44].mxu0  ;;  %5743 = vmatpush3.bf16.msra.mxu1 %v6496_v23  ;;  %5358 = vmatprep.mubr.msk.f32.mxu1 %vm6200_vm0, %v6201_v1 }
0x105c   :  { %v5349_v21 = vpop.f32.mrb[45].mxu0  ;;  %5744 = vmatprep.subr.bf16.mxu1 %v6199_v0 }
0x105f   :  { %5746 = vmatpush3.bf16.msra.mxu1 %v6503_v29 }
0x1060   :  { %5753 = vmatprep.subr.bf16.mxu1 %v6199_v0 }
0x1125   :  { %v3386_v22 = vpop.f32.mrb[40].mxu1  ;;  %v3761_v25 = vpop.f32.mrb[46].mxu0 }
0x1126   :  { %v6901_v27 = vadd.f32 %v6618_v24, %v3386_v22  ;;  %v5316_v30 = vpop.f32.mrb[41].mxu1  ;;  %v5371_v31 = vpop.f32.mrb[47].mxu0 }
0x1128   :  { %3390 = vmax.xlane.f32.xlu1 %v6901_v27 }
0x112d   :  { %v3544_v32 = vpop.f32.mrb[42].mxu1 }
0x112e   :  { %v3545_v34 = vadd.f32 %v3544_v32, %v3471_v16  ;;  %v5338_v36 = vpop.f32.mrb[43].mxu1 }
0x1130   :  { %v3548_v37 = vadd.f32 %v6519_v35, %v3545_v34 }
0x1132   :  { %v3549_v39 = vmax.f32 %v3548_v37, 0.0 }
0x1134   :  { %5359 = vmatmul.mubr.msk.f32.vlgmr.msra.gmra.mrb[44].mxu1 %vm248_vm1, %v3549_v39 }
0x1135   :  { %5755 = vmatpush3.bf16.msra.mxu1 %v6528_v43  ;;  %5380 = vmatprep.mubr.msk.f32.mxu1 %vm6200_vm0, %v6201_v1 }
0x1136   :  { %5756 = vmatprep.subr.bf16.mxu1 %v6199_v0 }
0x1139   :  { %5758 = vmatpush3.bf16.msra.mxu1 %v6544_v53 }
0x113a   :  { %5765 = vmatprep.subr.bf16.mxu1 %v6199_v0 }
0x1207   :  { %v3689_v40 = vpop.f32.mrb[44].mxu1 }
0x1208   :  { %v3690_v41 = vadd.f32 %v3689_v40, %v3616_v20  ;;  %v5360_v42 = vpop.f32.mrb[45].mxu1 }
0x120a   :  { %v3693_v44 = vadd.f32 %v6560_v58, %v3690_v41 }
0x120c   :  { %v3694_v35 = vmax.f32 %v3693_v44, 0.0 }
0x120e   :  { %5381 = vmatmul.mubr.msk.f32.vlgmr.msra.gmra.mrb[46].mxu1 %vm248_vm1, %v3694_v35 }
0x120f   :  { %5767 = vmatpush3.bf16.msra.mxu1 %v6469_v5  ;;  %5402 = vmatprep.mubr.msk.f32.mxu1 %vm6200_vm0, %v6201_v1 }
0x1210   :  { %5768 = vmatprep.subr.bf16.mxu1 %v6199_v0 }
0x1213   :  { %5770 = vmatpush3.bf16.msra.mxu1 %v6474_v13 }
0x1214   :  { %5777 = vmatprep.subr.bf16.mxu1 %v6199_v0 }
0x1216   :  { %5403 = vmatmul.mubr.msk.f32.vlgmr.msra.gmra.mrb[48].mxu1 %vm248_vm1, %v3549_v39 }
0x1217   :  { %5779 = vmatpush3.bf16.msra.mxu1 %v6485_v18  ;;  %5424 = vmatprep.mubr.msk.f32.mxu1 %vm6200_vm0, %v6201_v1 }
0x1218   :  { %5780 = vmatprep.subr.bf16.mxu1 %v6199_v0 }
0x121b   :  { %5782 = vmatpush3.bf16.msra.mxu1 %v6500_v26 }
0x121c   :  { %5789 = vmatprep.subr.bf16.mxu1 %v6199_v0 }
0x121e   :  { %5425 = vmatmul.mubr.msk.f32.vlgmr.msra.gmra.mrb[50].mxu1 %vm248_vm1, %v3694_v35  ;;  %v5859_v35 = vld [vmem:[%s7073_s9] ss:$0 sm:$0xff] }
0x121f   :  { %5791 = vmatpush3.bf16.msra.mxu1 %v6512_v33  ;;  %5446 = vmatprep.mubr.msk.f32.mxu1 %vm6200_vm0, %v6201_v1 }
0x1220   :  { %5792 = vmatprep.subr.bf16.mxu1 %v6199_v0 }
0x1223   :  { %5794 = vmatpush3.bf16.msra.mxu1 %v6539_v51  ;;  %v3927_v51 = vld [vmem:[#allocation2 + $0x38] sm:$0xff] }
0x1224   :  { %5801 = vmatprep.subr.bf16.mxu1 %v6199_v0 }
0x12e1   :  { %v3834_v5 = vpop.f32.mrb[46].mxu1 }
0x12e2   :  { %v3835_v13 = vadd.f32 %v3834_v5, %v3761_v25  ;;  %v5382_v18 = vpop.f32.mrb[47].mxu1 }
0x12e4   :  { %v3838_v26 = vadd.f32 %v6591_v8, %v3835_v13 }
0x12e6   :  { %v3839_v58 = vmax.f32 %v3838_v26, 0.0 }
0x12e8   :  { %5392 = vmatmul.mubr.msk.f32.vlgmr.msra.gmra.mrb[48].mxu0 %vm248_vm1, %v3839_v58  ;;  %5447 = vmatmul.mubr.msk.f32.vlgmr.msra.gmra.mrb[52].mxu1 %vm248_vm1, %v3839_v58 }
0x12e9   :  { %v3994_v33 = vpop.f32.mrb[48].mxu1  ;;  %5773 = vmatpush3.bf16.msra.mxu0 %v6471_v9  ;;  %5413 = vmatprep.mubr.msk.f32.mxu0 %vm6200_vm0, %v6201_v1 }
0x12ea   :  { %v5404_v45 = vpop.f32.mrb[49].mxu1  ;;  %5774 = vmatprep.subr.bf16.mxu0 %v6199_v0  ;;  %5803 = vmatpush3.bf16.msra.mxu1 %v6553_v57 }
0x12eb   :  { %5804 = vmatprep.subr.bf16.mxu1 %v6199_v0  ;;  %5468 = vmatprep.mubr.msk.f32.mxu1 %vm6200_vm0, %v6201_v1 }
0x12ed   :  { %5776 = vmatpush3.bf16.msra.mxu0 %v6479_v14  ;;  %v777_v14 = vpop.xlane.xlu0 %776 }
0x12ee   :  { %5783 = vmatprep.subr.bf16.mxu0 %v6199_v0  ;;  %5806 = vmatpush3.bf16.msra.mxu1 %v6584_v7  ;;  %v778_v8 = vsub.f32 %v6621_v28, %v777_v14 }
0x12f0   :  { %5414 = vmatmul.mubr.msk.f32.vlgmr.msra.gmra.mrb[50].mxu0 %vm248_vm1, %v3927_v51  ;;  %v779_v47 = vmul.f32 1.442695, %v778_v8  ;;  %v5860_v51 = vld [vmem:[%s7076_s12] ss:$0 sm:$0xff]  ;;  %v2345_v8 = vpop.xlane.xlu1 %2344  ;;  %s6202_s12 = smov [#allocation20]  }
0x12f1   :  { %v6949_v9 = vpop.f32.mrb[50].mxu1  ;;  %5785 = vmatpush3.bf16.msra.mxu0 %v6496_v23  ;;  %5435 = vmatprep.mubr.msk.f32.mxu0 %vm6200_vm0, %v6201_v1  ;;  %v6958_v7 = vpop.xlane.xlu0 %1298  ;;  %s4470_s11 = sshll.u32 %s6202_s12, 4  ;;  %s4471_s11 = int_to_ptr.vmem [resolvable:$true] %s4470_s11 }
0x12f2   :  { %v5426_v57 = vpop.f32.mrb[51].mxu1  ;;  %5786 = vmatprep.subr.bf16.mxu0 %v6199_v0  ;;  %5826 = vpow2.f32 %v779_v47  ;;  %v2346_v47 = vsub.f32 %v6789_v11, %v2345_v8  ;;  %s6081_s0 = scalar_lea.vmem %s4471_s11, 128  ;;  %p6086_p11 = scmp.lt.s32.totalorder %s4471_s11, %s4471_s11 }
0x12f3   :  { %5828 = vpow2.f32 %v1824_v50  ;;  %p6082_p10 = scmp.ne.s32.totalorder %s4471_s11, %s6081_s0  ;;  %p6087_p12 = scmp.lt.s32.totalorder %s6081_s0, %s6081_s0 }
0x12f4   :  { %v3391_v49 = vpop.xlane.xlu1 %3390 }
0x12f5   :  { %5788 = vmatpush3.bf16.msra.mxu0 %v6503_v29  ;;  %v2868_v23 = vpop.xlane.xlu0 %2867  ;;  %v3392_v50 = vsub.f32 %v6901_v27, %v3391_v49  ;;  %p6088_p13 = por %p6087_p12, %p6086_p11 }
0x12f6   :  { %5795 = vmatprep.subr.bf16.mxu0 %v6199_v0  ;;  %v2869_v52 = vsub.f32 %v6845_v48, %v2868_v23 }
0x12f7   :  { %p6089_p0 = pnand %p6088_p13, %p6082_p10 }
0x12f8   :  { %v2870_v54 = vmul.f32 1.442695, %v2869_v52  ;;  %v3393_v52 = vmul.f32 1.442695, %v3392_v50 }
0x12fa   :  { %5830 = vpow2.f32 %v2870_v54 }
0x12fc   :  { %v5827_v62 = vpop.eup %5826 }
0x12fd   :  { %v5829_v4 = vpop.eup %5828 }
0x1304   :  { %v5831_v15 = vpop.eup %5830 }
0x13bb   :  { %v3909_v55 = vpop.f32.mrb[48].mxu0  ;;  %v6962_v29 = vpop.f32.mrb[52].mxu1 }
0x13bc   :  { %v6965_v56 = vadd.f32 %v6618_v24, %v3909_v55  ;;  %v5393_v59 = vpop.f32.mrb[49].mxu0  ;;  %v5448_v60 = vpop.f32.mrb[53].mxu1 }
0x13be   :  { %3913 = vmax.xlane.f32.xlu0 %v6965_v56 }
0x13c2   :  { %781 = vadd.xlane.f32.xlu0 %v5827_v62 }
0x13c3   :  { %v4067_v63 = vpop.f32.mrb[50].mxu0 }
0x13c4   :  { %v4068_v2 = vadd.f32 %v4067_v63, %v3994_v33  ;;  %v5415_v3 = vpop.f32.mrb[51].mxu0 }
0x13c6   :  { %v4071_v10 = vadd.f32 %v5858_v6, %v4068_v2  ;;  %1826 = vadd.xlane.f32.xlu0 %v5829_v4 }
0x13c8   :  { %v4072_v12 = vmax.f32 %v4071_v10, 0.0 }
0x13ca   :  { %4449 = vst.msk [vmem:[#allocation20] sm:$0xff] %vm248_vm1, %v4072_v12  ;;  %5436 = vmatmul.mubr.msk.f32.vlgmr.msra.gmra.mrb[52].mxu0 %vm248_vm1, %v4072_v12  ;;  %2872 = vadd.xlane.f32.xlu0 %v5831_v15 }
0x13cb   :  { %5797 = vmatpush3.bf16.msra.mxu0 %v6528_v43  ;;  %5457 = vmatprep.mubr.msk.f32.mxu0 %vm6200_vm0, %v6201_v1 }
0x13cc   :  { %5798 = vmatprep.subr.bf16.mxu0 %v6199_v0 }
0x13cf   :  { %5800 = vmatpush3.bf16.msra.mxu0 %v6544_v53 }
0x144b   :  { %v3914_v16 = vpop.xlane.xlu0 %3913 }
0x144c   :  { %v3915_v17 = vsub.f32 %v6965_v56, %v3914_v16 }
0x144e   :  { %v3916_v19 = vmul.f32 1.442695, %v3915_v17 }
0x144f   :  { %v782_v20 = vpop.xlane.xlu0 %781 }
0x1450   :  { %5832 = vpow2.f32 %v3916_v19 }
0x1451   :  { %5834 = vlog2.f32 %v782_v20 }
0x1453   :  { %v1827_v21 = vpop.xlane.xlu0 %1826 }
0x1454   :  { %5836 = vlog2.f32 %v1827_v21 }
0x1457   :  { %v2873_v22 = vpop.xlane.xlu0 %2872 }
0x1458   :  { %5838 = vlog2.f32 %v2873_v22 }
0x145a   :  { %v5833_v25 = vpop.eup %5832 }
0x145b   :  { %v5835_v43 = vpop.eup %5834  ;;  %3918 = vadd.xlane.f32.xlu0 %v5833_v25 }
0x145c   :  { %v784_v30 = vmul.f32 0.6931472, %v5835_v43 }
0x145e   :  { %v5837_v1 = vpop.eup %5836  ;;  %v785_v31 = vadd.f32 %v784_v30, %v777_v14  ;;  %v1300_v14 = vsub.f32 %v6677_v61, %v6958_v7 }
0x145f   :  { %v1829_v0 = vmul.f32 0.6931472, %v5837_v1 }
0x1460   :  { %v786_v53 = vsub.f32 %v6621_v28, %v785_v31 }
0x1461   :  { %v1830_v32 = vadd.f32 %v1829_v0, %v1822_v46  ;;  %v1301_v46 = vmul.f32 1.442695, %v1300_v14 }
0x1462   :  { %v5839_v34 = vpop.eup %5838  ;;  %787 = vst [vmem:[#allocation19] sm:$0xff] %v786_v53 }
0x1463   :  { %v1831_v36 = vsub.f32 %v6733_v38, %v1830_v32  ;;  %v2875_v37 = vmul.f32 0.6931472, %v5839_v34 }
0x1465   :  { %1833 = vst [vmem:[#allocation19 + $0x10] sm:$0xff] %v1831_v36  ;;  %v2876_v39 = vadd.f32 %v2875_v37, %v2868_v23  ;;  %v2347_v23 = vmul.f32 1.442695, %v2346_v47 }
0x1467   :  { %v2877_v40 = vsub.f32 %v6845_v48, %v2876_v39 }
0x1469   :  { %2879 = vst [vmem:[#allocation19 + $0x20] sm:$0xff] %v2877_v40 }
0x149d   :  { %v4212_v41 = vpop.f32.mrb[52].mxu0 }
0x149e   :  { %v4213_v42 = vadd.f32 %v4212_v41, %v6949_v9  ;;  %v5437_v44 = vpop.f32.mrb[53].mxu0 }
0x14a0   :  { %v4216_v28 = vadd.f32 %v5859_v35, %v4213_v42 }
0x14a2   :  { %v4217_v5 = vmax.f32 %v4216_v28, 0.0 }
0x14a4   :  { %4450 = vst.msk [vmem:[#allocation22] sm:$0xff] %vm248_vm1, %v4217_v5  ;;  %5458 = vmatmul.mubr.msk.f32.vlgmr.msra.gmra.mrb[54].mxu0 %vm248_vm1, %v4217_v5 }
0x14e8   :  { %v3919_v38 = vpop.xlane.xlu0 %3918 }
0x14e9   :  { %5840 = vlog2.f32 %v3919_v38 }
0x14ea   :  { %5842 = vpow2.f32 %v1301_v46 }
0x14eb   :  { %5844 = vpow2.f32 %v2347_v23 }
0x14ec   :  { %5846 = vpow2.f32 %v3393_v52 }
0x14f3   :  { %v5841_v13 = vpop.eup %5840 }
0x14f4   :  { %v3921_v18 = vmul.f32 0.6931472, %v5841_v13 }
0x14f6   :  { %v3922_v48 = vadd.f32 %v3921_v18, %v3914_v16 }
0x14f8   :  { %v3923_v26 = vsub.f32 %v6965_v56, %v3922_v48  ;;  %v5843_v56 = vpop.eup %5842 }
0x14f9   :  { %v5845_v59 = vpop.eup %5844 }
0x14fa   :  { %3925 = vst [vmem:[#allocation19 + $0x30] sm:$0xff] %v3923_v26  ;;  %v5847_v60 = vpop.eup %5846 }
0x1577   :  { %v4357_v58 = vpop.f32.mrb[54].mxu0 }
0x1578   :  { %v4358_v33 = vadd.f32 %v4357_v58, %v6962_v29  ;;  %v5459_v45 = vpop.f32.mrb[55].mxu0 }
0x157a   :  { %v4361_v9 = vadd.f32 %v5860_v51, %v4358_v33 }
0x157c   :  { %v4362_v57 = vmax.f32 %v4361_v9, 0.0 }
0x157e   :  { %4451 = vst.msk [vmem:[#allocation23] sm:$0xff] %vm248_vm1, %v4362_v57  ;;  %5469 = vmatmul.mubr.msk.f32.vlgmr.msra.gmra.mrb[54].mxu1 %vm248_vm1, %v4362_v57 }
0x1651   :  { %v4432_v54 = vpop.f32.mrb[54].mxu1 }
0x1652   :  { %v7000_v55 = vadd.f32 %v6618_v24, %v4432_v54  ;;  %v5470_v29 = vpop.f32.mrb[55].mxu1 }
0x1654   :  { %4436 = vmax.xlane.f32.xlu1 %v7000_v55 }
0x1658   :  { %1303 = vadd.xlane.f32.xlu1 %v5843_v56 }
0x165c   :  { %2349 = vadd.xlane.f32.xlu1 %v5845_v59 }
0x1660   :  { %3395 = vadd.xlane.f32.xlu1 %v5847_v60 }
0x16e1   :  { %v7003_v62 = vpop.xlane.xlu1 %4436 }
0x16e2   :  { %v4438_v63 = vsub.f32 %v7000_v55, %v7003_v62 }
0x16e4   :  { %v4439_v2 = vmul.f32 1.442695, %v4438_v63 }
0x16e5   :  { %v1304_v3 = vpop.xlane.xlu1 %1303 }
0x16e6   :  { %5848 = vpow2.f32 %v4439_v2 }
0x16e7   :  { %5850 = vlog2.f32 %v1304_v3 }
0x16e9   :  { %v2350_v24 = vpop.xlane.xlu1 %2349 }
0x16ea   :  { %5852 = vlog2.f32 %v2350_v24 }
0x16ed   :  { %v3396_v4 = vpop.xlane.xlu1 %3395 }
0x16ee   :  { %5854 = vlog2.f32 %v3396_v4 }
0x16f0   :  { %v5849_v6 = vpop.eup %5848 }
0x16f1   :  { %v5851_v10 = vpop.eup %5850  ;;  %4441 = vadd.xlane.f32.xlu1 %v5849_v6 }
0x16f2   :  { %v1306_v12 = vmul.f32 0.6931472, %v5851_v10 }
0x16f4   :  { %v5853_v15 = vpop.eup %5852  ;;  %v1307_v16 = vadd.f32 %v1306_v12, %v6958_v7 }
0x16f5   :  { %v2352_v17 = vmul.f32 0.6931472, %v5853_v15 }
0x16f6   :  { %v1308_v19 = vsub.f32 %v6677_v61, %v1307_v16 }
0x16f7   :  { %v2353_v20 = vadd.f32 %v2352_v17, %v2345_v8 }
0x16f8   :  { %v5855_v21 = vpop.eup %5854  ;;  %1310 = vst [vmem:[#allocation19 + $0x8] sm:$0xff] %v1308_v19 }
0x16f9   :  { %v2354_v22 = vsub.f32 %v6789_v11, %v2353_v20  ;;  %v3398_v25 = vmul.f32 0.6931472, %v5855_v21 }
0x16fb   :  { %2356 = vst [vmem:[#allocation19 + $0x18] sm:$0xff] %v2354_v22  ;;  %v3399_v43 = vadd.f32 %v3398_v25, %v3391_v49 }
0x16fd   :  { %v3400_v30 = vsub.f32 %v6901_v27, %v3399_v43 }
0x16ff   :  { %3402 = vst [vmem:[#allocation19 + $0x28] sm:$0xff] %v3400_v30 }
0x1700   :  { %6092 = shalt.err (!%p6089_p0)
}
0x1701   :  { %s6093_s3 = scalar_lea.hbm %s7080_s16, 128 }
0x1702   :  { %p6094_p1 = scmp.ne.s32.totalorder %s7080_s16, %s6093_s3  ;;  %p6097_p2 = scmp.lt.u32.totalorder %s6093_s3, %s7080_s16 }
0x1704   :  { %p6099_p3 = pnand %p6097_p2, %p6094_p1 }
0x1706   :  { %6102 = shalt.err (!%p6099_p3)
}
0x1707   :  { %4473 = dma.vmem_to_hbm [thread:$0]  %s4471_s11, 128, %s7080_s16, [#allocation21]  }
0x1708   :  { %s6203_s22 = smov [#allocation22]   ;;  %s6204_s23 = smov [#allocation23]  }
0x1709   :  { %s4480_s10 = sshll.u32 %s6203_s22, 4  ;;  %s4490_s25 = sshll.u32 %s6204_s23, 4  ;;  %s4481_s10 = int_to_ptr.vmem [resolvable:$true] %s4480_s10  ;;  %s4491_s25 = int_to_ptr.vmem [resolvable:$true] %s4490_s25 }
0x170a   :  { %s6103_s4 = scalar_lea.vmem %s4481_s10, 128  ;;  %p6108_p5 = scmp.lt.s32.totalorder %s4481_s10, %s4481_s10 }
0x170b   :  { %p6104_p4 = scmp.ne.s32.totalorder %s4481_s10, %s6103_s4  ;;  %p6109_p6 = scmp.lt.s32.totalorder %s6103_s4, %s6103_s4 }
0x170d   :  { %p6110_p7 = por %p6109_p6, %p6108_p5 }
0x170f   :  { %p6111_p8 = pnand %p6110_p7, %p6104_p4 }
0x1711   :  { %6114 = shalt.err (!%p6111_p8)
}
0x1712   :  { %s6115_s14 = scalar_lea.hbm %s7081_s17, 128 }
0x1713   :  { %p6116_p9 = scmp.ne.s32.totalorder %s7081_s17, %s6115_s14  ;;  %p6119_p10 = scmp.lt.u32.totalorder %s6115_s14, %s7081_s17 }
0x1715   :  { %p6121_p11 = pnand %p6119_p10, %p6116_p9 }
0x1717   :  { %6124 = shalt.err (!%p6121_p11)
}
0x1718   :  { %4483 = dma.vmem_to_hbm [thread:$0]  %s4481_s10, 128, %s7081_s17, [#allocation21]  }
0x1719   :  { %s6125_s12 = scalar_lea.vmem %s4491_s25, 128  ;;  %p6130_p13 = scmp.lt.s32.totalorder %s4491_s25, %s4491_s25 }
0x171a   :  { %p6126_p12 = scmp.ne.s32.totalorder %s4491_s25, %s6125_s12  ;;  %p6131_p0 = scmp.lt.s32.totalorder %s6125_s12, %s6125_s12 }
0x171c   :  { %p6132_p1 = por %p6131_p0, %p6130_p13 }
0x171e   :  { %p6133_p2 = pnand %p6132_p1, %p6126_p12 }
0x1720   :  { %6136 = shalt.err (!%p6133_p2)
}
0x1721   :  { %s6137_s13 = scalar_lea.hbm %s7082_s18, 128 }
0x1722   :  { %p6138_p3 = scmp.ne.s32.totalorder %s7082_s18, %s6137_s13  ;;  %p6141_p4 = scmp.lt.u32.totalorder %s6137_s13, %s7082_s18 }
0x1724   :  { %p6143_p5 = pnand %p6141_p4, %p6138_p3 }
0x1726   :  { %6146 = shalt.err (!%p6143_p5)
}
0x1727   :  { %4493 = dma.vmem_to_hbm [thread:$0]  %s4491_s25, 128, %s7082_s18, [#allocation24]  }
0x1728   :  { %s6205_s24 = smov [#allocation19]  }
0x1729   :  { %s4457_s7 = sshll.u32 %s6205_s24, 4  ;;  %s4458_s7 = int_to_ptr.vmem [resolvable:$true] %s4457_s7 }
0x172a   :  { %s6147_s5 = scalar_lea.vmem %s4458_s7, 1024  ;;  %p6152_p7 = scmp.lt.s32.totalorder %s4458_s7, %s4458_s7 }
0x172b   :  { %p6148_p6 = scmp.ne.s32.totalorder %s4458_s7, %s6147_s5  ;;  %p6153_p8 = scmp.lt.s32.totalorder %s6147_s5, %s6147_s5 }
0x172d   :  { %p6154_p9 = por %p6153_p8, %p6152_p7 }
0x172f   :  { %p6155_p10 = pnand %p6154_p9, %p6148_p6 }
0x177e   :  { %v4442_v61 = vpop.xlane.xlu1 %4441 }
0x177f   :  { %5856 = vlog2.f32 %v4442_v61 }
0x1789   :  { %v5857_v11 = vpop.eup %5856 }
0x178a   :  { %v4444_v27 = vmul.f32 0.6931472, %v5857_v11 }
0x178c   :  { %v4445_v7 = vadd.f32 %v4444_v27, %v7003_v62 }
0x178e   :  { %v4446_v1 = vsub.f32 %v7000_v55, %v4445_v7 }
0x1790   :  { %4448 = vst [vmem:[#allocation19 + $0x38] sm:$0xff] %v4446_v1 }
0x1791   :  { %6158 = shalt.err (!%p6155_p10)
}
0x1792   :  { %s6159_s10 = scalar_lea.hbm %s7079_s15, 1024 }
0x1793   :  { %p6160_p11 = scmp.ne.s32.totalorder %s7079_s15, %s6159_s10  ;;  %p6163_p12 = scmp.lt.u32.totalorder %s6159_s10, %s7079_s15 }
0x1795   :  { %p6165_p13 = pnand %p6163_p12, %p6160_p11 }
0x1797   :  { %6168 = shalt.err (!%p6165_p13)
}
0x1798   :  { %4463 = dma.vmem_to_hbm [thread:$0]  %s4458_s7, 1024, %s7079_s15, [#allocation4], %s6191_s30, %s6191_s30, %s6192_s2  }
0x1799   :  { %6181 = dma.done.wait [#allocation4], 1024  }
0x179a   :  { %6182 = vsyncadd [#allocation4], 4294966272 }
0x179b   :  { %6183 = dma.done.wait [#allocation21], 256  }
0x179c   :  { %6184 = vsyncadd [#allocation21], 4294967040 }
0x179d   :  { %6185 = dma.done.wait [#allocation24], 128  }
0x179e   :  { %6186 = vsyncadd [#allocation24], 4294967168 }
0x179f   :  { %4506 = vsyncpa [#allocation3], 1 }
0x17a0   :  { %4507 = vsyncpa [#allocation6], 1 }
0x17a1   :  { %4508 = vsyncpa [#allocation9], 1 }
0x17a2   :  { %4509 = vsyncpa [#allocation12], 1 }
0x17a3   :  { %4510 = vsyncpa [#allocation15], 1 }
0x17a4   :  { %4511 = vsyncpa [#allocation18], 1 }
0x17a5   :  { %4512 = vsyncpa [#allocation4], 1 }
0x17a6   :  { %4513 = vsyncpa [#allocation21], 1 }
0x17a7   :  { %4514 = vsyncpa [#allocation24], 1 }

</bundles_post_ra>
